<compile_context>
chip_gen: v7x
topology: tpu7x:2x2x1
jax: 0.10.0
libtpu: 0.0.40
codegen_flags: <defaults>
</compile_context>

<pallas_src>
import jax
import jax.numpy as jnp
from jax import lax
from jax.experimental import pallas as pl
from jax.experimental.pallas import tpu as pltpu

LANE = 128


def _round_up(v, m):
    return (v + m - 1) // m * m


# ---------------------------------------------------------------- kernel -----

def _down_kernel(x_ref, w1_ref, b1_ref, w2_ref, b2_ref, o_ref, pad1, pad2):
    """Fused maxpool(2x2) -> conv3x3+bias+ReLU -> conv3x3+bias+ReLU for one image.

    x_ref : (1, H2, 2, W2, 2*Cin)   bf16   pool window pre-split by a free reshape
    w1_ref: (3, 3*Cin, Cmid)        bf16   BN scale folded in; axis1 = (dx, cin)
    b1_ref: (1, Cmid)               f32
    w2_ref: (3, 3*Cmid, Cout)       bf16
    b2_ref: (1, Cout)               f32
    o_ref : (1, H2, W2, Cout)       f32
    pad1  : (H2+2, W2+2, Cin)       bf16 scratch (zero halo for SAME conv1)
    pad2  : (H2+2, W2+2, Cmid)      bf16 scratch (zero halo for SAME conv2)
    """
    H2, W2 = o_ref.shape[1], o_ref.shape[2]
    Cin = pad1.shape[-1]
    Cmid = pad2.shape[-1]
    Cout = o_ref.shape[-1]
    M = H2 * W2

    # ---- 2x2 max pool (lane-aligned slice for the horizontal pair, leading dim for vertical)
    x = x_ref[0]                                        # (H2, 2, W2, 2*Cin)
    hmax = jnp.maximum(x[..., :Cin], x[..., Cin:])      # (H2, 2, W2, Cin)
    pooled = jnp.maximum(hmax[:, 0], hmax[:, 1])        # (H2, W2, Cin)

    # ---- conv1 (3x3, SAME): 3 MXU matmuls with K = 3*Cin (dx folded into K)
    pad1[...] = jnp.zeros_like(pad1)                    # zero halo (interior overwritten)
    pad1[1:H2 + 1, 1:W2 + 1, :] = pooled

    acc1 = jnp.zeros((M, Cmid), jnp.float32)
    for dy in range(3):
        slab = pad1[dy:dy + H2, :, :]                   # (H2, W2+2, Cin)
        win = jnp.concatenate(
            [slab[:, 0:W2, :], slab[:, 1:W2 + 1, :], slab[:, 2:W2 + 2, :]],
            axis=-1).reshape(M, 3 * Cin)                # (M, 3*Cin)
        acc1 += jnp.dot(win, w1_ref[dy], preferred_element_type=jnp.float32)
    h = jnp.maximum(acc1 + b1_ref[...], 0.0)            # BN bias + ReLU in f32

    # ---- conv2 (3x3, SAME); intermediate never leaves VMEM
    pad2[...] = jnp.zeros_like(pad2)
    pad2[1:H2 + 1, 1:W2 + 1, :] = h.astype(pad2.dtype).reshape(H2, W2, Cmid)

    acc2 = jnp.zeros((M, Cout), jnp.float32)
    for dy in range(3):
        slab = pad2[dy:dy + H2, :, :]                   # (H2, W2+2, Cmid)
        win = jnp.concatenate(
            [slab[:, 0:W2, :], slab[:, 1:W2 + 1, :], slab[:, 2:W2 + 2, :]],
            axis=-1).reshape(M, 3 * Cmid)               # (M, 3*Cmid)
        acc2 += jnp.dot(win, w2_ref[dy], preferred_element_type=jnp.float32)
    y = jnp.maximum(acc2 + b2_ref[...], 0.0)

    o_ref[0] = y.reshape(H2, W2, Cout).astype(o_ref.dtype)


# --------------------------------------------------------------- wrapper -----

def down_forward(x_nchw, p):
    N, Cin, H, W = x_nchw.shape
    assert H % 2 == 0 and W % 2 == 0, "MaxPool2d(2) path assumes even H, W"
    H2, W2 = H // 2, W // 2

    w1, b1 = p["w1"], p["bias1"]          # (3,3,Cin,Cmid) f32 (BN scale folded), (Cmid,)
    w2, b2 = p["w2"], p["bias2"]
    Cmid, Cout = w1.shape[-1], w2.shape[-1]

    Cin_p = _round_up(Cin, LANE)
    Cmid_p = _round_up(Cmid, LANE)
    Cout_p = _round_up(Cout, LANE)

    # NCHW -> NHWC, zero-pad channels to a lane-dense width, cast to bf16, and split
    # the two pool strides with a free contiguous reshape (no strided HBM copies).
    x = jnp.transpose(x_nchw, (0, 2, 3, 1))
    x = jnp.pad(x, ((0, 0), (0, 0), (0, 0), (0, Cin_p - Cin))).astype(jnp.bfloat16)
    x = x.reshape(N, H2, 2, W2, 2 * Cin_p)

    def prep_w(w, cin_p, cout_p):
        cin, cout = w.shape[2], w.shape[3]
        wp = jnp.pad(w, ((0, 0), (0, 0), (0, cin_p - cin), (0, cout_p - cout)))
        # (3, 3, cin_p, cout_p) -> (3, 3*cin_p, cout_p): axis1 ordered (dx, cin),
        # matching the in-kernel window concatenation order.
        return wp.reshape(3, 3 * cin_p, cout_p).astype(jnp.bfloat16)

    def prep_b(b, cout_p):
        return jnp.pad(b, (0, cout_p - b.shape[0])).reshape(1, cout_p).astype(jnp.float32)

    w1p, b1p = prep_w(w1, Cin_p, Cmid_p), prep_b(b1, Cmid_p)
    w2p, b2p = prep_w(w2, Cmid_p, Cout_p), prep_b(b2, Cout_p)

    out = pl.pallas_call(
        _down_kernel,
        out_shape=jax.ShapeDtypeStruct((N, H2, W2, Cout_p), jnp.float32),
        grid=(N,),
        in_specs=[
            pl.BlockSpec((1, H2, 2, W2, 2 * Cin_p), lambda b: (b, 0, 0, 0, 0)),
            pl.BlockSpec((3, 3 * Cin_p, Cmid_p), lambda b: (0, 0, 0)),
            pl.BlockSpec((1, Cmid_p), lambda b: (0, 0)),
            pl.BlockSpec((3, 3 * Cmid_p, Cout_p), lambda b: (0, 0, 0)),
            pl.BlockSpec((1, Cout_p), lambda b: (0, 0)),
        ],
        out_specs=pl.BlockSpec((1, H2, W2, Cout_p), lambda b: (b, 0, 0, 0)),
        scratch_shapes=[
            pltpu.VMEM((H2 + 2, W2 + 2, Cin_p), jnp.bfloat16),
            pltpu.VMEM((H2 + 2, W2 + 2, Cmid_p), jnp.bfloat16),
        ],
        compiler_params=pltpu.CompilerParams(
            dimension_semantics=("parallel",),
            vmem_limit_bytes=32 * 1024 * 1024,   # <2 MiB actually used; fits v5e/v6e/v7x
        ),
    )(x, w1p, b1p, w2p, b2p)

    out = out[..., :Cout]                         # drop lane padding
    return jnp.transpose(out, (0, 3, 1, 2))       # NHWC -> NCHW


# ------------------------------------------------------------ parameters -----

def init_params(key, in_channels, out_channels):
    eps = 1e-5
    ks = jax.random.split(key, 8)

    def conv_bn(kw, kb, kg, kbe, cin, cout):
        w = 0.1 * jax.random.normal(kw, (3, 3, cin, cout), jnp.float32)   # HWIO
        conv_b = 0.1 * jax.random.normal(kb, (cout,), jnp.float32)
        gamma = 1.0 + 0.1 * jax.random.normal(kg, (cout,), jnp.float32)
        beta = 0.1 * jax.random.normal(kbe, (cout,), jnp.float32)
        # BN inference mode: running_mean=0, running_var=1 (fresh PyTorch module)
        scale = gamma / jnp.sqrt(1.0 + eps)
        w_eff = w * scale                      # fold BN scale into conv weights
        bias = conv_b * scale + beta           # fold conv bias + BN shift
        return w_eff, bias

    w1, b1 = conv_bn(ks[0], ks[1], ks[2], ks[3], in_channels, out_channels)
    w2, b2 = conv_bn(ks[4], ks[5], ks[6], ks[7], out_channels, out_channels)
    return {"w1": w1, "bias1": b1, "w2": w2, "bias2": b2}


# ------------------------------------------------------------- reference -----

def down_reference(x_nchw, p):
    # Mirrors the kernel's numerics: bf16 activations/weights, f32 accumulation/epilogue.
    x = jnp.transpose(x_nchw, (0, 2, 3, 1)).astype(jnp.bfloat16)
    x = jnp.maximum(jnp.maximum(x[:, 0::2, 0::2], x[:, 1::2, 0::2]),
                    jnp.maximum(x[:, 0::2, 1::2], x[:, 1::2, 1::2]))

    def conv_block(x16, w, b):
        y = lax.conv_general_dilated(
            x16, w.astype(jnp.bfloat16), (1, 1), "SAME",
            dimension_numbers=("NHWC", "HWIO", "NHWC"),
            preferred_element_type=jnp.float32)
        return jnp.maximum(y + b, 0.0)

    h = conv_block(x, p["w1"], p["bias1"]).astype(jnp.bfloat16)
    y = conv_block(h, p["w2"], p["bias2"])
    return jnp.transpose(y, (0, 3, 1, 2))


# ------------------------------------------------------------------ main -----

if __name__ == "__main__":
    key = jax.random.PRNGKey(0)
    k_x, k_p = jax.random.split(key)

    in_channels, out_channels = 4, 8
    x = jax.random.normal(k_x, (2, in_channels, 16, 16), jnp.float32)  # NCHW
    params = init_params(k_p, in_channels, out_channels)

    out = jax.jit(down_forward)(x, params)
    out = jax.block_until_ready(out)

    ref = down_reference(x, params)
    assert out.shape == (2, out_channels, 8, 8), out.shape
    max_err = float(jnp.max(jnp.abs(out - ref)))
    assert jnp.allclose(out, ref, atol=1e-2, rtol=1e-2), max_err

    print("KERNEL_OK")
</pallas_src>

<mosaic_0001>
module attributes {stable_mosaic.version = 11 : i64} {
  func.func @_down_kernel(%arg0: i32, %arg1: memref<1x8x2x8x256xbf16, #tpu.memory_space<vmem>>, %arg2: memref<3x384x128xbf16, #tpu.memory_space<vmem>>, %arg3: memref<1x128xf32, #tpu.memory_space<vmem>>, %arg4: memref<3x384x128xbf16, #tpu.memory_space<vmem>>, %arg5: memref<1x128xf32, #tpu.memory_space<vmem>>, %arg6: memref<1x8x8x128xf32, #tpu.memory_space<vmem>>, %arg7: memref<10x10x128xbf16, #tpu.memory_space<vmem>>, %arg8: memref<10x10x128xbf16, #tpu.memory_space<vmem>>) attributes {dimension_semantics = [#tpu.dimension_semantics<parallel>], iteration_bounds = array<i64: 2>, scalar_prefetch = 0 : i64, scratch_operands = 2 : i64, tpu.core_type = #tpu.core_type<tc>, window_params = [{transform_indices = @transform_0, window_bounds = array<i64: 1, 8, 2, 8, 256>}, {pipeline_mode = #tpu.pipeline_mode<synchronous>, transform_indices = @transform_1, window_bounds = array<i64: 3, 384, 128>}, {pipeline_mode = #tpu.pipeline_mode<synchronous>, transform_indices = @transform_2, window_bounds = array<i64: 1, 128>}, {pipeline_mode = #tpu.pipeline_mode<synchronous>, transform_indices = @transform_3, window_bounds = array<i64: 3, 384, 128>}, {pipeline_mode = #tpu.pipeline_mode<synchronous>, transform_indices = @transform_4, window_bounds = array<i64: 1, 128>}, {transform_indices = @transform_5, window_bounds = array<i64: 1, 8, 8, 128>}]} {
    %c0 = arith.constant 0 : index
    %c0_0 = arith.constant 0 : index
    %c0_1 = arith.constant 0 : index
    %c0_2 = arith.constant 0 : index
    %c0_3 = arith.constant 0 : index
    %0 = vector.load %arg1[%c0, %c0_0, %c0_1, %c0_2, %c0_3] : memref<1x8x2x8x256xbf16, #tpu.memory_space<vmem>>, vector<1x8x2x8x256xbf16>
    %1 = vector.shape_cast %0 : vector<1x8x2x8x256xbf16> to vector<8x2x8x256xbf16>
    %2 = vector.extract_strided_slice %1 {offsets = [0, 0, 0, 0], sizes = [8, 2, 8, 128], strides = [1, 1, 1, 1]} : vector<8x2x8x256xbf16> to vector<8x2x8x128xbf16>
    %3 = vector.extract_strided_slice %1 {offsets = [0, 0, 0, 128], sizes = [8, 2, 8, 128], strides = [1, 1, 1, 1]} : vector<8x2x8x256xbf16> to vector<8x2x8x128xbf16>
    %4 = arith.maximumf %2, %3 : vector<8x2x8x128xbf16>
    %5 = vector.extract_strided_slice %4 {offsets = [0, 0, 0, 0], sizes = [8, 1, 8, 128], strides = [1, 1, 1, 1]} : vector<8x2x8x128xbf16> to vector<8x1x8x128xbf16>
    %6 = vector.shape_cast %5 : vector<8x1x8x128xbf16> to vector<8x8x128xbf16>
    %7 = vector.extract_strided_slice %4 {offsets = [0, 1, 0, 0], sizes = [8, 1, 8, 128], strides = [1, 1, 1, 1]} : vector<8x2x8x128xbf16> to vector<8x1x8x128xbf16>
    %8 = vector.shape_cast %7 : vector<8x1x8x128xbf16> to vector<8x8x128xbf16>
    %9 = arith.maximumf %6, %8 : vector<8x8x128xbf16>
    %cst = arith.constant 0.000000e+00 : bf16
    %10 = vector.broadcast %cst : bf16 to vector<10x10x128xbf16>
    %c0_4 = arith.constant 0 : index
    %c0_5 = arith.constant 0 : index
    %c0_6 = arith.constant 0 : index
    %11 = vector.load %arg7[%c0_4, %c0_5, %c0_6] : memref<10x10x128xbf16, #tpu.memory_space<vmem>>, vector<10x10x128xbf16>
    tpu.vector_store %arg7[%c0_4, %c0_5, %c0_6], %10 {strides = array<i32>} : memref<10x10x128xbf16, #tpu.memory_space<vmem>>, vector<10x10x128xbf16>,
    %c1 = arith.constant 1 : index
    %c1_7 = arith.constant 1 : index
    %c0_8 = arith.constant 0 : index
    %12 = vector.load %arg7[%c1, %c1_7, %c0_8] : memref<10x10x128xbf16, #tpu.memory_space<vmem>>, vector<8x8x128xbf16>
    tpu.vector_store %arg7[%c1, %c1_7, %c0_8], %9 {strides = array<i32>} : memref<10x10x128xbf16, #tpu.memory_space<vmem>>, vector<8x8x128xbf16>,
    %cst_9 = arith.constant 0.000000e+00 : f32
    %13 = vector.broadcast %cst_9 : f32 to vector<64x128xf32>
    %c0_10 = arith.constant 0 : index
    %c0_11 = arith.constant 0 : index
    %c0_12 = arith.constant 0 : index
    %14 = vector.load %arg7[%c0_10, %c0_11, %c0_12] : memref<10x10x128xbf16, #tpu.memory_space<vmem>>, vector<8x10x128xbf16>
    %15 = vector.extract_strided_slice %14 {offsets = [0, 0, 0], sizes = [8, 8, 128], strides = [1, 1, 1]} : vector<8x10x128xbf16> to vector<8x8x128xbf16>
    %16 = vector.extract_strided_slice %14 {offsets = [0, 1, 0], sizes = [8, 8, 128], strides = [1, 1, 1]} : vector<8x10x128xbf16> to vector<8x8x128xbf16>
    %17 = vector.extract_strided_slice %14 {offsets = [0, 2, 0], sizes = [8, 8, 128], strides = [1, 1, 1]} : vector<8x10x128xbf16> to vector<8x8x128xbf16>
    %18 = tpu.concatenate %15, %16, %17 in 2 : vector<8x8x128xbf16>, vector<8x8x128xbf16>, vector<8x8x128xbf16> -> vector<8x8x384xbf16>
    %19 = vector.shape_cast %18 : vector<8x8x384xbf16> to vector<64x384xbf16>
    %c0_13 = arith.constant 0 : index
    %c0_14 = arith.constant 0 : index
    %c0_15 = arith.constant 0 : index
    %20 = vector.load %arg2[%c0_13, %c0_14, %c0_15] : memref<3x384x128xbf16, #tpu.memory_space<vmem>>, vector<1x384x128xbf16>
    %21 = vector.shape_cast %20 : vector<1x384x128xbf16> to vector<384x128xbf16>
    %cst_16 = arith.constant dense<0.000000e+00> : vector<64x128xf32>
    %22 = tpu.matmul %19, %21, %cst_16 {dimension_numbers = #tpu.dot_dimension_numbers<[1], [0], [0], [1], [0, 0, 1, 1], [], []>} : vector<64x384xbf16>, vector<384x128xbf16>, vector<64x128xf32> -> vector<64x128xf32>
    %23 = arith.addf %13, %22 : vector<64x128xf32>
    %c1_17 = arith.constant 1 : index
    %c0_18 = arith.constant 0 : index
    %c0_19 = arith.constant 0 : index
    %24 = vector.load %arg7[%c1_17, %c0_18, %c0_19] : memref<10x10x128xbf16, #tpu.memory_space<vmem>>, vector<8x10x128xbf16>
    %25 = vector.extract_strided_slice %24 {offsets = [0, 0, 0], sizes = [8, 8, 128], strides = [1, 1, 1]} : vector<8x10x128xbf16> to vector<8x8x128xbf16>
    %26 = vector.extract_strided_slice %24 {offsets = [0, 1, 0], sizes = [8, 8, 128], strides = [1, 1, 1]} : vector<8x10x128xbf16> to vector<8x8x128xbf16>
    %27 = vector.extract_strided_slice %24 {offsets = [0, 2, 0], sizes = [8, 8, 128], strides = [1, 1, 1]} : vector<8x10x128xbf16> to vector<8x8x128xbf16>
    %28 = tpu.concatenate %25, %26, %27 in 2 : vector<8x8x128xbf16>, vector<8x8x128xbf16>, vector<8x8x128xbf16> -> vector<8x8x384xbf16>
    %29 = vector.shape_cast %28 : vector<8x8x384xbf16> to vector<64x384xbf16>
    %c1_20 = arith.constant 1 : index
    %c0_21 = arith.constant 0 : index
    %c0_22 = arith.constant 0 : index
    %30 = vector.load %arg2[%c1_20, %c0_21, %c0_22] : memref<3x384x128xbf16, #tpu.memory_space<vmem>>, vector<1x384x128xbf16>
    %31 = vector.shape_cast %30 : vector<1x384x128xbf16> to vector<384x128xbf16>
    %cst_23 = arith.constant dense<0.000000e+00> : vector<64x128xf32>
    %32 = tpu.matmul %29, %31, %cst_23 {dimension_numbers = #tpu.dot_dimension_numbers<[1], [0], [0], [1], [0, 0, 1, 1], [], []>} : vector<64x384xbf16>, vector<384x128xbf16>, vector<64x128xf32> -> vector<64x128xf32>
    %33 = arith.addf %23, %32 : vector<64x128xf32>
    %c2 = arith.constant 2 : index
    %c0_24 = arith.constant 0 : index
    %c0_25 = arith.constant 0 : index
    %34 = vector.load %arg7[%c2, %c0_24, %c0_25] : memref<10x10x128xbf16, #tpu.memory_space<vmem>>, vector<8x10x128xbf16>
    %35 = vector.extract_strided_slice %34 {offsets = [0, 0, 0], sizes = [8, 8, 128], strides = [1, 1, 1]} : vector<8x10x128xbf16> to vector<8x8x128xbf16>
    %36 = vector.extract_strided_slice %34 {offsets = [0, 1, 0], sizes = [8, 8, 128], strides = [1, 1, 1]} : vector<8x10x128xbf16> to vector<8x8x128xbf16>
    %37 = vector.extract_strided_slice %34 {offsets = [0, 2, 0], sizes = [8, 8, 128], strides = [1, 1, 1]} : vector<8x10x128xbf16> to vector<8x8x128xbf16>
    %38 = tpu.concatenate %35, %36, %37 in 2 : vector<8x8x128xbf16>, vector<8x8x128xbf16>, vector<8x8x128xbf16> -> vector<8x8x384xbf16>
    %39 = vector.shape_cast %38 : vector<8x8x384xbf16> to vector<64x384xbf16>
    %c2_26 = arith.constant 2 : index
    %c0_27 = arith.constant 0 : index
    %c0_28 = arith.constant 0 : index
    %40 = vector.load %arg2[%c2_26, %c0_27, %c0_28] : memref<3x384x128xbf16, #tpu.memory_space<vmem>>, vector<1x384x128xbf16>
    %41 = vector.shape_cast %40 : vector<1x384x128xbf16> to vector<384x128xbf16>
    %cst_29 = arith.constant dense<0.000000e+00> : vector<64x128xf32>
    %42 = tpu.matmul %39, %41, %cst_29 {dimension_numbers = #tpu.dot_dimension_numbers<[1], [0], [0], [1], [0, 0, 1, 1], [], []>} : vector<64x384xbf16>, vector<384x128xbf16>, vector<64x128xf32> -> vector<64x128xf32>
    %43 = arith.addf %33, %42 : vector<64x128xf32>
    %c0_30 = arith.constant 0 : index
    %c0_31 = arith.constant 0 : index
    %44 = vector.load %arg3[%c0_30, %c0_31] : memref<1x128xf32, #tpu.memory_space<vmem>>, vector<1x128xf32>
    %45 = vector.broadcast %44 : vector<1x128xf32> to vector<64x128xf32>
    %46 = arith.addf %43, %45 : vector<64x128xf32>
    %cst_32 = arith.constant 0.000000e+00 : f32
    %47 = vector.broadcast %cst_32 : f32 to vector<64x128xf32>
    %48 = arith.maximumf %46, %47 : vector<64x128xf32>
    %cst_33 = arith.constant 0.000000e+00 : bf16
    %49 = vector.broadcast %cst_33 : bf16 to vector<10x10x128xbf16>
    %c0_34 = arith.constant 0 : index
    %c0_35 = arith.constant 0 : index
    %c0_36 = arith.constant 0 : index
    %50 = vector.load %arg8[%c0_34, %c0_35, %c0_36] : memref<10x10x128xbf16, #tpu.memory_space<vmem>>, vector<10x10x128xbf16>
    tpu.vector_store %arg8[%c0_34, %c0_35, %c0_36], %49 {strides = array<i32>} : memref<10x10x128xbf16, #tpu.memory_space<vmem>>, vector<10x10x128xbf16>,
    %51 = arith.truncf %48 : vector<64x128xf32> to vector<64x128xbf16>
    %52 = vector.shape_cast %51 : vector<64x128xbf16> to vector<8x8x128xbf16>
    %c1_37 = arith.constant 1 : index
    %c1_38 = arith.constant 1 : index
    %c0_39 = arith.constant 0 : index
    %53 = vector.load %arg8[%c1_37, %c1_38, %c0_39] : memref<10x10x128xbf16, #tpu.memory_space<vmem>>, vector<8x8x128xbf16>
    tpu.vector_store %arg8[%c1_37, %c1_38, %c0_39], %52 {strides = array<i32>} : memref<10x10x128xbf16, #tpu.memory_space<vmem>>, vector<8x8x128xbf16>,
    %cst_40 = arith.constant 0.000000e+00 : f32
    %54 = vector.broadcast %cst_40 : f32 to vector<64x128xf32>
    %c0_41 = arith.constant 0 : index
    %c0_42 = arith.constant 0 : index
    %c0_43 = arith.constant 0 : index
    %55 = vector.load %arg8[%c0_41, %c0_42, %c0_43] : memref<10x10x128xbf16, #tpu.memory_space<vmem>>, vector<8x10x128xbf16>
    %56 = vector.extract_strided_slice %55 {offsets = [0, 0, 0], sizes = [8, 8, 128], strides = [1, 1, 1]} : vector<8x10x128xbf16> to vector<8x8x128xbf16>
    %57 = vector.extract_strided_slice %55 {offsets = [0, 1, 0], sizes = [8, 8, 128], strides = [1, 1, 1]} : vector<8x10x128xbf16> to vector<8x8x128xbf16>
    %58 = vector.extract_strided_slice %55 {offsets = [0, 2, 0], sizes = [8, 8, 128], strides = [1, 1, 1]} : vector<8x10x128xbf16> to vector<8x8x128xbf16>
    %59 = tpu.concatenate %56, %57, %58 in 2 : vector<8x8x128xbf16>, vector<8x8x128xbf16>, vector<8x8x128xbf16> -> vector<8x8x384xbf16>
    %60 = vector.shape_cast %59 : vector<8x8x384xbf16> to vector<64x384xbf16>
    %c0_44 = arith.constant 0 : index
    %c0_45 = arith.constant 0 : index
    %c0_46 = arith.constant 0 : index
    %61 = vector.load %arg4[%c0_44, %c0_45, %c0_46] : memref<3x384x128xbf16, #tpu.memory_space<vmem>>, vector<1x384x128xbf16>
    %62 = vector.shape_cast %61 : vector<1x384x128xbf16> to vector<384x128xbf16>
    %cst_47 = arith.constant dense<0.000000e+00> : vector<64x128xf32>
    %63 = tpu.matmul %60, %62, %cst_47 {dimension_numbers = #tpu.dot_dimension_numbers<[1], [0], [0], [1], [0, 0, 1, 1], [], []>} : vector<64x384xbf16>, vector<384x128xbf16>, vector<64x128xf32> -> vector<64x128xf32>
    %64 = arith.addf %54, %63 : vector<64x128xf32>
    %c1_48 = arith.constant 1 : index
    %c0_49 = arith.constant 0 : index
    %c0_50 = arith.constant 0 : index
    %65 = vector.load %arg8[%c1_48, %c0_49, %c0_50] : memref<10x10x128xbf16, #tpu.memory_space<vmem>>, vector<8x10x128xbf16>
    %66 = vector.extract_strided_slice %65 {offsets = [0, 0, 0], sizes = [8, 8, 128], strides = [1, 1, 1]} : vector<8x10x128xbf16> to vector<8x8x128xbf16>
    %67 = vector.extract_strided_slice %65 {offsets = [0, 1, 0], sizes = [8, 8, 128], strides = [1, 1, 1]} : vector<8x10x128xbf16> to vector<8x8x128xbf16>
    %68 = vector.extract_strided_slice %65 {offsets = [0, 2, 0], sizes = [8, 8, 128], strides = [1, 1, 1]} : vector<8x10x128xbf16> to vector<8x8x128xbf16>
    %69 = tpu.concatenate %66, %67, %68 in 2 : vector<8x8x128xbf16>, vector<8x8x128xbf16>, vector<8x8x128xbf16> -> vector<8x8x384xbf16>
    %70 = vector.shape_cast %69 : vector<8x8x384xbf16> to vector<64x384xbf16>
    %c1_51 = arith.constant 1 : index
    %c0_52 = arith.constant 0 : index
    %c0_53 = arith.constant 0 : index
    %71 = vector.load %arg4[%c1_51, %c0_52, %c0_53] : memref<3x384x128xbf16, #tpu.memory_space<vmem>>, vector<1x384x128xbf16>
    %72 = vector.shape_cast %71 : vector<1x384x128xbf16> to vector<384x128xbf16>
    %cst_54 = arith.constant dense<0.000000e+00> : vector<64x128xf32>
    %73 = tpu.matmul %70, %72, %cst_54 {dimension_numbers = #tpu.dot_dimension_numbers<[1], [0], [0], [1], [0, 0, 1, 1], [], []>} : vector<64x384xbf16>, vector<384x128xbf16>, vector<64x128xf32> -> vector<64x128xf32>
    %74 = arith.addf %64, %73 : vector<64x128xf32>
    %c2_55 = arith.constant 2 : index
    %c0_56 = arith.constant 0 : index
    %c0_57 = arith.constant 0 : index
    %75 = vector.load %arg8[%c2_55, %c0_56, %c0_57] : memref<10x10x128xbf16, #tpu.memory_space<vmem>>, vector<8x10x128xbf16>
    %76 = vector.extract_strided_slice %75 {offsets = [0, 0, 0], sizes = [8, 8, 128], strides = [1, 1, 1]} : vector<8x10x128xbf16> to vector<8x8x128xbf16>
    %77 = vector.extract_strided_slice %75 {offsets = [0, 1, 0], sizes = [8, 8, 128], strides = [1, 1, 1]} : vector<8x10x128xbf16> to vector<8x8x128xbf16>
    %78 = vector.extract_strided_slice %75 {offsets = [0, 2, 0], sizes = [8, 8, 128], strides = [1, 1, 1]} : vector<8x10x128xbf16> to vector<8x8x128xbf16>
    %79 = tpu.concatenate %76, %77, %78 in 2 : vector<8x8x128xbf16>, vector<8x8x128xbf16>, vector<8x8x128xbf16> -> vector<8x8x384xbf16>
    %80 = vector.shape_cast %79 : vector<8x8x384xbf16> to vector<64x384xbf16>
    %c2_58 = arith.constant 2 : index
    %c0_59 = arith.constant 0 : index
    %c0_60 = arith.constant 0 : index
    %81 = vector.load %arg4[%c2_58, %c0_59, %c0_60] : memref<3x384x128xbf16, #tpu.memory_space<vmem>>, vector<1x384x128xbf16>
    %82 = vector.shape_cast %81 : vector<1x384x128xbf16> to vector<384x128xbf16>
    %cst_61 = arith.constant dense<0.000000e+00> : vector<64x128xf32>
    %83 = tpu.matmul %80, %82, %cst_61 {dimension_numbers = #tpu.dot_dimension_numbers<[1], [0], [0], [1], [0, 0, 1, 1], [], []>} : vector<64x384xbf16>, vector<384x128xbf16>, vector<64x128xf32> -> vector<64x128xf32>
    %84 = arith.addf %74, %83 : vector<64x128xf32>
    %c0_62 = arith.constant 0 : index
    %c0_63 = arith.constant 0 : index
    %85 = vector.load %arg5[%c0_62, %c0_63] : memref<1x128xf32, #tpu.memory_space<vmem>>, vector<1x128xf32>
    %86 = vector.broadcast %85 : vector<1x128xf32> to vector<64x128xf32>
    %87 = arith.addf %84, %86 : vector<64x128xf32>
    %cst_64 = arith.constant 0.000000e+00 : f32
    %88 = vector.broadcast %cst_64 : f32 to vector<64x128xf32>
    %89 = arith.maximumf %87, %88 : vector<64x128xf32>
    %90 = vector.shape_cast %89 : vector<64x128xf32> to vector<8x8x128xf32>
    %c0_65 = arith.constant 0 : index
    %c0_66 = arith.constant 0 : index
    %c0_67 = arith.constant 0 : index
    %c0_68 = arith.constant 0 : index
    %91 = vector.load %arg6[%c0_65, %c0_66, %c0_67, %c0_68] : memref<1x8x8x128xf32, #tpu.memory_space<vmem>>, vector<1x8x8x128xf32>
    %92 = vector.shape_cast %91 : vector<1x8x8x128xf32> to vector<8x8x128xf32>
    %93 = vector.shape_cast %90 : vector<8x8x128xf32> to vector<1x8x8x128xf32>
    tpu.vector_store %arg6[%c0_65, %c0_66, %c0_67, %c0_68], %93 {strides = array<i32>} : memref<1x8x8x128xf32, #tpu.memory_space<vmem>>, vector<1x8x8x128xf32>,
    return
  }
  func.func @transform_0(%arg0: i32) -> (i32, i32, i32, i32, i32) {
    %c0_i32 = arith.constant 0 : i32
    %c0_i32_0 = arith.constant 0 : i32
    %c0_i32_1 = arith.constant 0 : i32
    %c0_i32_2 = arith.constant 0 : i32
    %c0_i32_3 = arith.constant 0 : i32
    return %arg0, %c0_i32, %c0_i32_0, %c0_i32_1, %c0_i32_2 : i32, i32, i32, i32, i32
  }
  func.func @transform_1(%arg0: i32) -> (i32, i32, i32) {
    %c0_i32 = arith.constant 0 : i32
    %c0_i32_0 = arith.constant 0 : i32
    %c0_i32_1 = arith.constant 0 : i32
    %c0_i32_2 = arith.constant 0 : i32
    return %c0_i32, %c0_i32_0, %c0_i32_1 : i32, i32, i32
  }
  func.func @transform_2(%arg0: i32) -> (i32, i32) {
    %c0_i32 = arith.constant 0 : i32
    %c0_i32_0 = arith.constant 0 : i32
    %c0_i32_1 = arith.constant 0 : i32
    return %c0_i32, %c0_i32_0 : i32, i32
  }
  func.func @transform_3(%arg0: i32) -> (i32, i32, i32) {
    %c0_i32 = arith.constant 0 : i32
    %c0_i32_0 = arith.constant 0 : i32
    %c0_i32_1 = arith.constant 0 : i32
    %c0_i32_2 = arith.constant 0 : i32
    return %c0_i32, %c0_i32_0, %c0_i32_1 : i32, i32, i32
  }
  func.func @transform_4(%arg0: i32) -> (i32, i32) {
    %c0_i32 = arith.constant 0 : i32
    %c0_i32_0 = arith.constant 0 : i32
    %c0_i32_1 = arith.constant 0 : i32
    return %c0_i32, %c0_i32_0 : i32, i32
  }
  func.func @transform_5(%arg0: i32) -> (i32, i32, i32, i32) {
    %c0_i32 = arith.constant 0 : i32
    %c0_i32_0 = arith.constant 0 : i32
    %c0_i32_1 = arith.constant 0 : i32
    %c0_i32_2 = arith.constant 0 : i32
    return %arg0, %c0_i32, %c0_i32_0, %c0_i32_1 : i32, i32, i32, i32
  }
}

</mosaic_0001>

<bundles_post_ra>
// kernel: down_forward.1
= control target key start
LH: loop header
LB: loop body
LE: loop exit
PB: predicated region body
PF: predicated region fallthrough
CT: control target
= control target key end

     0   :  { %s4952_s18 = smov 0   ;;  %s5843_s0 = inlined_call_operand.vmem [shape: bf16[2,8,2,8,256], index: 0, kind: input, shape index: {}]   ;;  %s5844_s1 = inlined_call_operand.vmem [shape: bf16[3,384,128], index: 1, kind: input, shape index: {}]   ;;  %s5845_s2 = inlined_call_operand.vmem [shape: f32[1,128], index: 2, kind: input, shape index: {}]   ;;  %s5846_s3 = inlined_call_operand.vmem [shape: bf16[3,384,128], index: 3, kind: input, shape index: {}]   ;;  %s5847_s4 = inlined_call_operand.vmem [shape: f32[1,128], index: 4, kind: input, shape index: {}]   ;;  %s5848_s5 = inlined_call_operand.vmem [shape: f32[2,8,8,128], index: 5, kind: output, shape index: {}]  }
   0x1 LB: > { %s3665_s19 = sadd.s32 4294967295, %s4919_s18   ;;  %p3669_p0 = scmp.ge.s32.totalorder %s4919_s18, 1  ;;  %s4919_s18 = sphi %s4952_s18, %s15_s18  }
   0x2   : > { %p187_p1 = scmp.lt.s32.totalorder %s4919_s18, 3 }
   0x4   : > { %p188_p2 = pnand %p3669_p0, %p187_p1 }
   0x5   : > { %v4697_v0 = vld [vmem:[%s5844_s1 + $0x140] sm:$0xff] (!%p188_p2)   ;;  %v4921_v3 = vmov (!%p188_p2), 0   ;;  %v4700_v4 = vld [vmem:[%s5844_s1 + $0x148] sm:$0xff] (!%p188_p2)   ;;  %v4703_v7 = vld [vmem:[%s5844_s1 + $0x150] sm:$0xff] (!%p188_p2)   ;;  %p215_p3 = scmp.lt.s32.totalorder (!%p188_p2), %s3665_s19, 1  ;;  %vm415_vm0 = vcmask (!%p188_p2), 1043456  }
   0x6   : > { %191 = sbr.rel (%p188_p2) target bundleno = 698 (0x2ba), region = 40  ;;  %v4698_v1 = vld [vmem:[%s5844_s1 + $0x100] sm:$0xff] (!%p188_p2)   ;;  %4464 = vmatprep.subr.bf16.mxu1 (!%p188_p2), %v4697_v0  ;;  %316 = vst [vmem:[#allocation2 + $0x8] sm:$0xf] (!%p188_p2), %v4921_v3  ;;  %317 = vst [vmem:[#allocation2 + $0xc] sm:$0x1] (!%p188_p2), %v4921_v3 }
   0x7   : > { %v4699_v2 = vld [vmem:[%s5844_s1 + $0xc0] sm:$0xff] (!%p188_p2)   ;;  %318 = vst [vmem:[#allocation2 + $0x10] sm:$0xf] (!%p188_p2), %v4921_v3  ;;  %319 = vst [vmem:[#allocation2 + $0x14] sm:$0x1] (!%p188_p2), %v4921_v3  ;;  %4465 = vmatpush3.bf16.msra.mxu1 (!%p188_p2), %v4697_v0  ;;  %4152 = vmatprep.subr.bf16.mxu0 (!%p188_p2), %v4698_v1  ;;  %v4701_v5 = vld [vmem:[%s5844_s1 + $0x108] sm:$0xff] (!%p188_p2)  }
   0x8   : > { %314 = vst [vmem:[#allocation2] sm:$0xf] (!%p188_p2), %v4921_v3  ;;  %315 = vst [vmem:[#allocation2 + $0x4] sm:$0x1] (!%p188_p2), %v4921_v3  ;;  %4153 = vmatpush3.bf16.msra.mxu0 (!%p188_p2), %v4699_v2  ;;  %4466 = vmatprep.subr.bf16.mxu1 (!%p188_p2), %v4700_v4  ;;  %v4702_v6 = vld [vmem:[%s5844_s1 + $0xc8] sm:$0xff] (!%p188_p2)   ;;  %v4704_v8 = vld [vmem:[%s5844_s1 + $0x110] sm:$0xff] (!%p188_p2)  }
   0x9   : > { %320 = vst [vmem:[#allocation2 + $0x18] sm:$0xf] (!%p188_p2), %v4921_v3  ;;  %321 = vst [vmem:[#allocation2 + $0x1c] sm:$0x1] (!%p188_p2), %v4921_v3  ;;  %4154 = vmatprep.subr.bf16.mxu0 (!%p188_p2), %v4701_v5  ;;  %v4705_v9 = vld [vmem:[%s5844_s1 + $0xd0] sm:$0xff] (!%p188_p2)   ;;  %v4706_v10 = vld [vmem:[%s5844_s1 + $0x158] sm:$0xff] (!%p188_p2)  }
   0xa   : > { %322 = vst [vmem:[#allocation2 + $0x20] sm:$0xf] (!%p188_p2), %v4921_v3  ;;  %323 = vst [vmem:[#allocation2 + $0x24] sm:$0x1] (!%p188_p2), %v4921_v3  ;;  %v4707_v11 = vld [vmem:[%s5844_s1 + $0x118] sm:$0xff] (!%p188_p2)   ;;  %v4709_v13 = vld [vmem:[%s5844_s1 + $0x160] sm:$0xff] (!%p188_p2)  }
   0xb   : > { %324 = vst [vmem:[#allocation2 + $0x28] sm:$0xf] (!%p188_p2), %v4921_v3  ;;  %325 = vst [vmem:[#allocation2 + $0x2c] sm:$0x1] (!%p188_p2), %v4921_v3  ;;  %4467 = vmatpush3.bf16.msra.mxu1 (!%p188_p2), %v4700_v4  ;;  %v4708_v12 = vld [vmem:[%s5844_s1 + $0xd8] sm:$0xff] (!%p188_p2)   ;;  %v4710_v14 = vld [vmem:[%s5844_s1 + $0x120] sm:$0xff] (!%p188_p2)  }
   0xc   : > { %326 = vst [vmem:[#allocation2 + $0x30] sm:$0xf] (!%p188_p2), %v4921_v3  ;;  %327 = vst [vmem:[#allocation2 + $0x34] sm:$0x1] (!%p188_p2), %v4921_v3  ;;  %4155 = vmatpush3.bf16.msra.mxu0 (!%p188_p2), %v4702_v6  ;;  %4468 = vmatprep.subr.bf16.mxu1 (!%p188_p2), %v4703_v7  ;;  %v4711_v15 = vld [vmem:[%s5844_s1 + $0xe0] sm:$0xff] (!%p188_p2)   ;;  %v4712_v16 = vld [vmem:[%s5844_s1 + $0x168] sm:$0xff] (!%p188_p2)  }
   0xd   : > { %328 = vst [vmem:[#allocation2 + $0x38] sm:$0xf] %v4921_v3  ;;  %329 = vst [vmem:[#allocation2 + $0x3c] sm:$0x1] %v4921_v3  ;;  %4156 = vmatprep.subr.bf16.mxu0 %v4704_v8  ;;  %s5854_s19 = smov (!%p215_p3, %s3665_s19), 1  ;;  %v4713_v17 = vld [vmem:[%s5844_s1 + $0x128] sm:$0xff]  }
   0xe   : > { %330 = vst [vmem:[#allocation2 + $0x40] sm:$0xf] %v4921_v3  ;;  %331 = vst [vmem:[#allocation2 + $0x44] sm:$0x1] %v4921_v3  ;;  %s4142_s6 = sshll.u32 %s5854_s19, 7  ;;  %v4714_v18 = vld [vmem:[%s5844_s1 + $0xe8] sm:$0xff]  }
   0xf   : > { %332 = vst [vmem:[#allocation2 + $0x48] sm:$0xf] %v4921_v3  ;;  %333 = vst [vmem:[#allocation2 + $0x4c] sm:$0x1] %v4921_v3  ;;  %4469 = vmatpush3.bf16.msra.mxu1 %v4703_v7  ;;  %v4715_v19 = vld [vmem:[%s5844_s1 + $0x170] sm:$0xff]   ;;  %s5030_s15 = scalar_lea.vmem %s5843_s0, %s4142_s6  ;;  %v4718_v22 = vld [vmem:[%s5844_s1 + $0x178] sm:$0xff]  }
  0x10   : > { %1949 = vst [vmem:[#allocation3] sm:$0xf] %v4921_v3  ;;  %1950 = vst [vmem:[#allocation3 + $0x4] sm:$0x1] %v4921_v3  ;;  %4157 = vmatpush3.bf16.msra.mxu0 %v4705_v9  ;;  %4470 = vmatprep.subr.bf16.mxu1 %v4706_v10  ;;  %v4716_v20 = vld [vmem:[%s5844_s1 + $0x130] sm:$0xff]   ;;  %v226_v23 = vld [vmem:[%s5030_s15] sm:$0xff] }
  0x11   : > { %1951 = vst [vmem:[#allocation3 + $0x8] sm:$0xf] %v4921_v3  ;;  %1952 = vst [vmem:[#allocation3 + $0xc] sm:$0x1] %v4921_v3  ;;  %4158 = vmatprep.subr.bf16.mxu0 %v4707_v11  ;;  %v4717_v21 = vld [vmem:[%s5844_s1 + $0xf0] sm:$0xff]   ;;  %v227_v24 = vld [vmem:[%s5030_s15 + $0x8] sm:$0xff] }
  0x12   : > { %1953 = vst [vmem:[#allocation3 + $0x10] sm:$0xf] %v4921_v3  ;;  %1954 = vst [vmem:[#allocation3 + $0x14] sm:$0x1] %v4921_v3  ;;  %v228_v25 = vld [vmem:[%s5030_s15 + $0x10] sm:$0xff]  ;;  %v4719_v26 = vld [vmem:[%s5844_s1 + $0x138] sm:$0xff]  }
  0x13   : > { %1955 = vst [vmem:[#allocation3 + $0x18] sm:$0xf] %v4921_v3  ;;  %1956 = vst [vmem:[#allocation3 + $0x1c] sm:$0x1] %v4921_v3  ;;  %4471 = vmatpush3.bf16.msra.mxu1 %v4706_v10  ;;  %v229_v27 = vld [vmem:[%s5030_s15 + $0x18] sm:$0xff]  ;;  %v258_v28 = vrot.slane %v226_v23, 4 }
  0x14   : > { %1957 = vst [vmem:[#allocation3 + $0x20] sm:$0xf] %v4921_v3  ;;  %1958 = vst [vmem:[#allocation3 + $0x24] sm:$0x1] %v4921_v3  ;;  %4159 = vmatpush3.bf16.msra.mxu0 %v4708_v12  ;;  %4472 = vmatprep.subr.bf16.mxu1 %v4709_v13  ;;  %v259_v29 = vrot.slane %v227_v24, 4  ;;  %v260_v30 = vrot.slane %v228_v25, 4 }
  0x15   : > { %1959 = vst [vmem:[#allocation3 + $0x28] sm:$0xf] %v4921_v3  ;;  %1960 = vst [vmem:[#allocation3 + $0x2c] sm:$0x1] %v4921_v3  ;;  %4160 = vmatprep.subr.bf16.mxu0 %v4710_v14  ;;  %v261_v31 = vrot.slane %v229_v27, 4  ;;  %v4720_v32 = vld [vmem:[%s5844_s1 + $0xf8] sm:$0xff]   ;;  %v290_v33 = vmax.bf16 %v258_v28, %v226_v23 }
  0x16   : > { %1961 = vst [vmem:[#allocation3 + $0x30] sm:$0xf] %v4921_v3  ;;  %1962 = vst [vmem:[#allocation3 + $0x34] sm:$0x1] %v4921_v3  ;;  %v291_v34 = vmax.bf16 %v259_v29, %v227_v24  ;;  %v292_v35 = vmax.bf16 %v260_v30, %v228_v25  ;;  %v5051_v36 = vld [vmem:[%s5844_s1 + $0x80] sm:$0xff]   ;;  %vm421_vm1 = vcmask 1040384  }
  0x17   : > { %1963 = vst [vmem:[#allocation3 + $0x38] sm:$0xf] %v4921_v3  ;;  %1964 = vst [vmem:[#allocation3 + $0x3c] sm:$0x1] %v4921_v3  ;;  %4473 = vmatpush3.bf16.msra.mxu1 %v4709_v13  ;;  %v293_v37 = vmax.bf16 %v261_v31, %v229_v27  ;;  %v230_v38 = vld [vmem:[%s5030_s15 + $0x20] sm:$0xff]  ;;  %v231_v40 = vld [vmem:[%s5030_s15 + $0x28] sm:$0xff] }
  0x18   : > { %1965 = vst [vmem:[#allocation3 + $0x40] sm:$0xf] %v4921_v3  ;;  %1966 = vst [vmem:[#allocation3 + $0x44] sm:$0x1] %v4921_v3  ;;  %4161 = vmatpush3.bf16.msra.mxu0 %v4711_v15  ;;  %4474 = vmatprep.subr.bf16.mxu1 %v4712_v16  ;;  %v306_v39 = vmax.bf16 %v291_v34, %v290_v33  ;;  %vm416_vm2 = vsmask.f32 7938 }
  0x19   : > { %1967 = vst [vmem:[#allocation3 + $0x48] sm:$0xf] %v4921_v3  ;;  %1968 = vst [vmem:[#allocation3 + $0x4c] sm:$0x1] %v4921_v3  ;;  %4162 = vmatprep.subr.bf16.mxu0 %v4713_v17  ;;  %v232_v41 = vld [vmem:[%s5030_s15 + $0x30] sm:$0xff]  ;;  %v233_v42 = vld [vmem:[%s5030_s15 + $0x38] sm:$0xff]  ;;  %v307_v44 = vmax.bf16 %v293_v37, %v292_v35 }
  0x1a   : > { %v262_v43 = vrot.slane %v230_v38, 4  ;;  %v263_v45 = vrot.slane %v231_v40, 4  ;;  %v264_v46 = vrot.slane %v232_v41, 4  ;;  %v265_v47 = vrot.slane %v233_v42, 4  ;;  %v4726_v48 = vld [vmem:[%s5844_s1 + $0x40] sm:$0xff]   ;;  %vm5063_vm4 = vmand %vm415_vm0, %vm416_vm2  ;;  %v235_v35 = vld [vmem:[%s5030_s15 + $0x48] sm:$0xff] }
  0x1b   : > { %4475 = vmatpush3.bf16.msra.mxu1 %v4712_v16  ;;  %v335_v49 = vshrl.u32 %v306_v39, 16  ;;  %v338_v50 = vshll.u32 %v306_v39, 16  ;;  %vm422_vm3 = vsmask.f32 256  ;;  %v343_v52 = vshrl.u32 %v307_v44, 16  ;;  %v234_v31 = vld [vmem:[%s5030_s15 + $0x40] sm:$0xff] }
  0x1c   : > { %4163 = vmatpush3.bf16.msra.mxu0 %v4714_v18  ;;  %4476 = vmatprep.subr.bf16.mxu1 %v4715_v19  ;;  %v294_v51 = vmax.bf16 %v262_v43, %v230_v38  ;;  %v346_v53 = vshll.u32 %v307_v44, 16  ;;  %v418_v54 = vld [vmem:[#allocation2 + $0x8] sm:$0xf]  ;;  %v424_v55 = vld [vmem:[#allocation2 + $0xc] sm:$0x1]  ;;  %v295_v56 = vmax.bf16 %v263_v45, %v231_v40  ;;  %v296_v57 = vmax.bf16 %v264_v46, %v232_v41  ;;  %vm5069_vm5 = vmand %vm421_vm1, %vm422_vm3  ;;  %s4143_s16 = sshll.u32 %s5854_s19, 6 }
  0x1d   : > { %4164 = vmatprep.subr.bf16.mxu0 %v4716_v20  ;;  %v337_v58 = vrot.slane %v335_v49, 7  ;;  %v427_v60 = vld [vmem:[#allocation2 + $0x10] sm:$0xf]  ;;  %v430_v61 = vld [vmem:[#allocation2 + $0x14] sm:$0x1]  ;;  %v297_v62 = vmax.bf16 %v265_v47, %v233_v42  ;;  %v345_v63 = vrot.slane %v343_v52, 7  ;;  %s5828_s21 = scalar_lea.vmem %s5848_s5, %s4143_s16 }
  0x1e   : > { %v308_v1 = vmax.bf16 %v295_v56, %v294_v51  ;;  %v433_v13 = vld [vmem:[#allocation2 + $0x18] sm:$0xf]  ;;  %v436_v14 = vld [vmem:[#allocation2 + $0x1c] sm:$0x1]  ;;  %v439_v18 = vld [vmem:[#allocation2 + $0x20] sm:$0xf] }
  0x1f   : > { %4477 = vmatpush3.bf16.msra.mxu1 %v4715_v19  ;;  %v340_v2 = vor.u32 %v338_v50, %v337_v58  ;;  %v341_v3 = vrot.slane %v337_v58, 4  ;;  %v309_v4 = vmax.bf16 %v297_v62, %v296_v57  ;;  %v348_v5 = vor.u32 %v346_v53, %v345_v63  ;;  %v442_v19 = vld [vmem:[#allocation2 + $0x24] sm:$0x1]  ;;  %v236_v39 = vld [vmem:[%s5030_s15 + $0x50] sm:$0xff]  ;;  %v237_v40 = vld [vmem:[%s5030_s15 + $0x58] sm:$0xff] }
  0x20   : > { %4165 = vmatpush3.bf16.msra.mxu0 %v4717_v21  ;;  %4478 = vmatprep.subr.bf16.mxu1 %v4718_v22  ;;  %v349_v6 = vrot.slane %v345_v63, 4  ;;  %v351_v7 = vshrl.u32 %v308_v1, 16  ;;  %v354_v8 = vshll.u32 %v308_v1, 16  ;;  %v266_v37 = vrot.slane %v234_v31, 4  ;;  %v4840_v0 = vld [vmem:[%s5846_s3 + $0x50] sm:$0xff]  }
  0x21   : > { %4166 = vmatprep.subr.bf16.mxu0 %v4719_v26  ;;  %v419_v9 = vsel %vm5063_vm4, %v340_v2, %v418_v54  ;;  %v425_v10 = vsel %vm5069_vm5, %v341_v3, %v424_v55  ;;  %v359_v11 = vshrl.u32 %v309_v4, 16  ;;  %v362_v12 = vshll.u32 %v309_v4, 16 }
  0x22   : > { %420 = vst [vmem:[#allocation2 + $0x8] sm:$0xf] %v419_v9  ;;  %426 = vst [vmem:[#allocation2 + $0xc] sm:$0x1] %v425_v10  ;;  %v428_v15 = vsel %vm5063_vm4, %v348_v5, %v427_v60  ;;  %v431_v16 = vsel %vm5069_vm5, %v349_v6, %v430_v61  ;;  %v353_v17 = vrot.slane %v351_v7, 7  ;;  %v267_v41 = vrot.slane %v235_v35, 4 }
  0x23   : > { %4479 = vmatpush3.bf16.msra.mxu1 %v4718_v22  ;;  %429 = vst [vmem:[#allocation2 + $0x10] sm:$0xf] %v428_v15  ;;  %432 = vst [vmem:[#allocation2 + $0x14] sm:$0x1] %v431_v16  ;;  %v361_v20 = vrot.slane %v359_v11, 7  ;;  %v268_v45 = vrot.slane %v236_v39, 4  ;;  %v298_v53 = vmax.bf16 %v266_v37, %v234_v31 }
  0x24   : > { %4167 = vmatpush3.bf16.msra.mxu0 %v4720_v32  ;;  %4488 = vmatprep.subr.bf16.mxu1 %v5051_v36  ;;  %v356_v21 = vor.u32 %v354_v8, %v353_v17  ;;  %v357_v22 = vrot.slane %v353_v17, 4  ;;  %v269_v49 = vrot.slane %v237_v40, 4  ;;  %v299_v54 = vmax.bf16 %v267_v41, %v235_v35  ;;  %v4728_v9 = vld [vmem:[%s5844_s1] sm:$0xff]   ;;  %v4733_v41 = vld [vmem:[%s5844_s1 + $0x50] sm:$0xff]  }
  0x25   : > { %4204 = vmatprep.subr.bf16.mxu0 %v4726_v48  ;;  %v364_v23 = vor.u32 %v362_v12, %v361_v20  ;;  %v365_v24 = vrot.slane %v361_v20, 4  ;;  %v300_v55 = vmax.bf16 %v268_v45, %v236_v39  ;;  %v4732_v39 = vld [vmem:[%s5844_s1 + $0x90] sm:$0xff]  }
  0x26   : > { %v434_v25 = vsel %vm5063_vm4, %v356_v21, %v433_v13  ;;  %v437_v26 = vsel %vm5069_vm5, %v357_v22, %v436_v14  ;;  %v301_v62 = vmax.bf16 %v269_v49, %v237_v40  ;;  %v310_v3 = vmax.bf16 %v299_v54, %v298_v53  ;;  %v4729_v14 = vld [vmem:[%s5844_s1 + $0x88] sm:$0xff]   ;;  %v4735_v49 = vld [vmem:[%s5844_s1 + $0x10] sm:$0xff]  }
  0x27   : > { %435 = vst [vmem:[#allocation2 + $0x18] sm:$0xf] %v434_v25  ;;  %438 = vst [vmem:[#allocation2 + $0x1c] sm:$0x1] %v437_v26  ;;  %v440_v27 = vsel %vm5063_vm4, %v364_v23, %v439_v18  ;;  %v443_v28 = vsel %vm5069_vm5, %v365_v24, %v442_v19  ;;  %v4730_v19 = vld [vmem:[%s5844_s1 + $0x48] sm:$0xff]  }
  0x28   : > { %441 = vst [vmem:[#allocation2 + $0x20] sm:$0xf] %v440_v27  ;;  %444 = vst [vmem:[#allocation2 + $0x24] sm:$0x1] %v443_v28  ;;  %v311_v12 = vmax.bf16 %v301_v62, %v300_v55  ;;  %v367_v16 = vshrl.u32 %v310_v3, 16  ;;  %v370_v17 = vshll.u32 %v310_v3, 16 }
  0x29   : > { %v5089_v29 = vld [vmem:[#allocation2 + $0x8] sm:$0xf]  ;;  %v654_v30 = vld [vmem:[#allocation2 + $0xc] sm:$0x1]  ;;  %v451_v28 = vld [vmem:[#allocation2 + $0x30] sm:$0xf] }
  0x2a   : > { %v5092_v32 = vld [vmem:[#allocation2 + $0x10] sm:$0xf]  ;;  %v656_v33 = vld [vmem:[#allocation2 + $0x14] sm:$0x1]  ;;  %v3682_v34 = vcombine.low %v5089_v29, %v654_v30  ;;  %v375_v21 = vshrl.u32 %v311_v12, 16  ;;  %v378_v22 = vshll.u32 %v311_v12, 16 }
  0x2b   : > { %v3683_v38 = vcombine.low %v5092_v32, %v656_v33  ;;  %v3738_v2 = vcombine.low %v5089_v29, %v5092_v32  ;;  %v445_v23 = vld [vmem:[#allocation2 + $0x28] sm:$0xf]  ;;  %v448_v24 = vld [vmem:[#allocation2 + $0x2c] sm:$0x1]  ;;  %v369_v27 = vrot.slane %v367_v16, 7  ;;  %v238_v30 = vld [vmem:[%s5030_s15 + $0x60] sm:$0xff] }
  0x2c   : > { %v765_v42 = vrot.slane %v3682_v34, 1  ;;  %v710_v43 = vshrl.u32 %v3682_v34, 16  ;;  %v712_v44 = vshll.u32 %v3682_v34, 16  ;;  %v4731_v25 = vld [vmem:[%s5844_s1 + $0x8] sm:$0xff]   ;;  %v454_v29 = vld [vmem:[#allocation2 + $0x34] sm:$0x1] }
  0x2d   : > { %v766_v46 = vrot.slane %v3683_v38, 1  ;;  %v717_v47 = vshrl.u32 %v3683_v38, 16  ;;  %v719_v48 = vshll.u32 %v3683_v38, 16  ;;  %v377_v32 = vrot.slane %v375_v21, 7  ;;  %v239_v33 = vld [vmem:[%s5030_s15 + $0x68] sm:$0xff]  ;;  %v240_v38 = vld [vmem:[%s5030_s15 + $0x70] sm:$0xff] }
  0x2e   : > { %v5099_v50 = vld [vmem:[#allocation2 + $0x18] sm:$0xf]  ;;  %v658_v51 = vld [vmem:[#allocation2 + $0x1c] sm:$0x1]  ;;  %v714_v52 = vrot.slane %v712_v44, 1  ;;  %v372_v35 = vor.u32 %v370_v17, %v369_v27  ;;  %v373_v37 = vrot.slane %v369_v27, 4 }
  0x2f   : > { %v3740_v56 = vcombine.low %v765_v42, %v766_v46  ;;  %v5101_v57 = vld [vmem:[#allocation2 + $0x20] sm:$0xf]  ;;  %v660_v58 = vld [vmem:[#allocation2 + $0x24] sm:$0x1]  ;;  %v3684_v60 = vcombine.low %v5099_v50, %v658_v51  ;;  %v721_v61 = vrot.slane %v719_v48, 1  ;;  %v380_v42 = vor.u32 %v378_v22, %v377_v32  ;;  %v4738_v62 = vld [vmem:[%s5844_s1 + $0x18] sm:$0xff]  }
  0x30   : > { %v3685_v63 = vcombine.low %v5101_v57, %v660_v58  ;;  %v715_v1 = vor.u32 %v714_v52, %v710_v43  ;;  %v3741_v34 = vcombine.low %v5099_v50, %v5101_v57  ;;  %v241_v43 = vld [vmem:[%s5030_s15 + $0x78] sm:$0xff]  ;;  %v270_v44 = vrot.slane %v238_v30, 4  ;;  %v4744_v17 = vld [vmem:[%s5844_s1 + $0x20] sm:$0xff]   ;;  %v4745_v22 = vld [vmem:[%s5844_s1 + $0xa8] sm:$0xff]  }
  0x31   : > { %4480 = vmatprep.mubr.bf16.mxu1 %v3740_v56  ;;  %v767_v4 = vrot.slane %v3684_v60, 1  ;;  %v722_v5 = vor.u32 %v721_v61, %v717_v47  ;;  %v724_v6 = vshrl.u32 %v3684_v60, 16  ;;  %v726_v7 = vshll.u32 %v3684_v60, 16  ;;  %v4736_v50 = vld [vmem:[%s5844_s1 + $0x98] sm:$0xff]  }
  0x32   : > { %v768_v8 = vrot.slane %v3685_v63, 1  ;;  %v731_v10 = vshrl.u32 %v3685_v63, 16  ;;  %v733_v11 = vshll.u32 %v3685_v63, 16  ;;  %v446_v45 = vsel %vm5063_vm4, %v372_v35, %v445_v23  ;;  %v4737_v57 = vld [vmem:[%s5844_s1 + $0x58] sm:$0xff]   ;;  %v4739_v63 = vld [vmem:[%s5844_s1 + $0xa0] sm:$0xff]  }
  0x33   : > { %v3739_v13 = vcombine.low %v715_v1, %v722_v5  ;;  %v728_v15 = vrot.slane %v726_v7, 1  ;;  %v449_v46 = vsel %vm5069_vm5, %v373_v37, %v448_v24  ;;  %v271_v47 = vrot.slane %v239_v33, 4  ;;  %447 = vst [vmem:[#allocation2 + $0x28] sm:$0xf] %v446_v45  ;;  %v4742_v1 = vld [vmem:[%s5844_s1 + $0x60] sm:$0xff]  }
  0x34   : > { %v3743_v18 = vcombine.low %v767_v4, %v768_v8  ;;  %v735_v20 = vrot.slane %v733_v11, 1  ;;  %v272_v48 = vrot.slane %v240_v38, 4  ;;  %450 = vst [vmem:[#allocation2 + $0x2c] sm:$0x1] %v449_v46  ;;  %v452_v51 = vsel %vm5063_vm4, %v380_v42, %v451_v28  ;;  %v470_v7 = vld [vmem:[#allocation2 + $0x4] sm:$0x1] }
  0x35   : > { %1038 = vmatprep.mubr.bf16.mxu0 %v3739_v13  ;;  %v729_v26 = vor.u32 %v728_v15, %v724_v6  ;;  %v273_v53 = vrot.slane %v241_v43, 4  ;;  %v302_v54 = vmax.bf16 %v270_v44, %v238_v30  ;;  %453 = vst [vmem:[#allocation2 + $0x30] sm:$0xf] %v452_v51  ;;  %v303_v55 = vmax.bf16 %v271_v47, %v239_v33  ;;  %v5158_v6 = vld [vmem:[#allocation2] sm:$0xf]  ;;  %v4746_v28 = vld [vmem:[%s5844_s1 + $0x68] sm:$0xff]  }
  0x36   : > { %4481 = vmatmul.mubr.bf16.vlgmr.msra.gmra.mrb[0].mxu1 %v3743_v18  ;;  %1039 = vmatmul.mubr.bf16.vlgmr.msra.gmra.mrb[0].mxu0 %v3738_v2  ;;  %v736_v31 = vor.u32 %v735_v20, %v731_v10  ;;  %v304_v56 = vmax.bf16 %v272_v48, %v240_v38  ;;  %v457_v11 = vld [vmem:[#allocation2 + $0x38] sm:$0xf]  ;;  %v460_v12 = vld [vmem:[#allocation2 + $0x3c] sm:$0x1]  ;;  %v463_v13 = vld [vmem:[#allocation2 + $0x40] sm:$0xf] }
  0x37   : > { %4489 = vmatpush3.bf16.msra.mxu1 %v5051_v36  ;;  %4205 = vmatpush3.bf16.msra.mxu0 %v4728_v9  ;;  %v381_v36 = vrot.slane %v377_v32, 4  ;;  %v305_v58 = vmax.bf16 %v273_v53, %v241_v43  ;;  %v312_v60 = vmax.bf16 %v303_v55, %v302_v54  ;;  %v5168_v20 = vld [vmem:[#allocation2 + $0x8] sm:$0xf]  ;;  %v4748_v43 = vld [vmem:[%s5844_s1 + $0xb0] sm:$0xff]   ;;  %v4755_v53 = vld [vmem:[%s5844_s1 + $0x78] sm:$0xff]  }
  0x38   : > { %4490 = vmatprep.subr.bf16.mxu1 %v4729_v14  ;;  %4206 = vmatprep.subr.bf16.mxu0 %v4730_v19  ;;  %v3742_v40 = vcombine.low %v729_v26, %v736_v31  ;;  %v466_v19 = vld [vmem:[#allocation2 + $0x44] sm:$0x1]  ;;  %v472_v31 = vld [vmem:[#allocation2 + $0xc] sm:$0x1]  ;;  %v4751_v47 = vld [vmem:[%s5844_s1 + $0x70] sm:$0xff]  }
  0x39   : > { %v455_v52 = vsel %vm5069_vm5, %v381_v36, %v454_v29  ;;  %v313_v61 = vmax.bf16 %v305_v58, %v304_v56  ;;  %v383_v2 = vshrl.u32 %v312_v60, 16  ;;  %v386_v3 = vshll.u32 %v312_v60, 16  ;;  %v4747_v38 = vld [vmem:[%s5844_s1 + $0x28] sm:$0xff]   ;;  %v474_v54 = vld [vmem:[#allocation2 + $0x14] sm:$0x1] }
  0x3a   : > { %1046 = vmatprep.mubr.bf16.mxu0 %v3742_v40  ;;  %456 = vst [vmem:[#allocation2 + $0x34] sm:$0x1] %v455_v52  ;;  %v5160_v8 = vld [vmem:[#allocation2 + $0x28] sm:$0xf]  ;;  %v5195_v45 = vcombine.low %v5168_v20, %v472_v31  ;;  %v4754_v52 = vld [vmem:[%s5844_s1 + $0xb8] sm:$0xff]  }
  0x3b   : > { %4491 = vmatpush3.bf16.msra.mxu1 %v4729_v14  ;;  %4207 = vmatpush3.bf16.msra.mxu0 %v4731_v25  ;;  %v391_v4 = vshrl.u32 %v313_v61, 16  ;;  %v394_v5 = vshll.u32 %v313_v61, 16  ;;  %v662_v9 = vld [vmem:[#allocation2 + $0x2c] sm:$0x1]  ;;  %v385_v10 = vrot.slane %v383_v2, 7  ;;  %v5175_v25 = vcombine.low %v5158_v6, %v470_v7  ;;  %v4756_v61 = vld [vmem:[%s5844_s1 + $0x38] sm:$0xff]  }
  0x3c   : > { %4492 = vmatprep.subr.bf16.mxu1 %v4732_v39  ;;  %4208 = vmatprep.subr.bf16.mxu0 %v4733_v41  ;;  %v5162_v14 = vld [vmem:[#allocation2 + $0x30] sm:$0xf]  ;;  %v3686_v16 = vcombine.low %v5160_v8, %v662_v9  ;;  %v5213_v55 = vld [vmem:[#allocation2 + $0x18] sm:$0xf]  ;;  %v535_v58 = vshll.u32 %v5195_v45, 16  ;;  %v533_v2 = vshrl.u32 %v5195_v45, 16 }
  0x3d   : > { %v393_v18 = vrot.slane %v391_v4, 7  ;;  %v388_v23 = vor.u32 %v386_v3, %v385_v10  ;;  %v389_v24 = vrot.slane %v385_v10, 4  ;;  %v3744_v51 = vcombine.low %v5160_v8, %v5162_v14  ;;  %v476_v60 = vld [vmem:[#allocation2 + $0x1c] sm:$0x1]  ;;  %v5227_v7 = vld [vmem:[%s5844_s1 + $0x200] sm:$0xff]  }
  0x3e   : > { %1047 = vmatmul.mubr.bf16.gmra.mrb[4].mxu0 %v3741_v34  ;;  %v738_v26 = vshrl.u32 %v3686_v16, 16  ;;  %v740_v27 = vshll.u32 %v3686_v16, 16  ;;  %v769_v29 = vrot.slane %v3686_v16, 1  ;;  %v4762_v9 = vld [vmem:[%s5844_s1 + $0x1c0] sm:$0xff]  }
  0x3f   : > { %4493 = vmatpush3.bf16.msra.mxu1 %v4732_v39  ;;  %4209 = vmatpush3.bf16.msra.mxu0 %v4735_v49  ;;  %v396_v30 = vor.u32 %v394_v5, %v393_v18  ;;  %v397_v35 = vrot.slane %v393_v18, 4  ;;  %v458_v39 = vsel %vm5063_vm4, %v388_v23, %v457_v11  ;;  %v461_v40 = vsel %vm5069_vm5, %v389_v24, %v460_v12  ;;  %v4753_v49 = vld [vmem:[%s5844_s1 + $0x30] sm:$0xff]  }
  0x40   : > { %4494 = vmatprep.subr.bf16.mxu1 %v4736_v50  ;;  %4210 = vmatprep.subr.bf16.mxu0 %v4737_v57  ;;  %v742_v37 = vrot.slane %v740_v27, 1  ;;  %459 = vst [vmem:[#allocation2 + $0x38] sm:$0xf] %v458_v39  ;;  %462 = vst [vmem:[#allocation2 + $0x3c] sm:$0x1] %v461_v40  ;;  %v528_v57 = vshll.u32 %v5175_v25, 16  ;;  %v3677_v12 = vcombine.low %v5213_v55, %v476_v60 }
  0x41   : > { %v664_v15 = vld [vmem:[#allocation2 + $0x34] sm:$0x1]  ;;  %v464_v41 = vsel %vm5063_vm4, %v396_v30, %v463_v13  ;;  %v467_v44 = vsel %vm5069_vm5, %v397_v35, %v466_v19  ;;  %v5235_v35 = vld [vmem:[#allocation2 + $0x20] sm:$0xf]  ;;  %v480_v40 = vld [vmem:[#allocation2 + $0x2c] sm:$0x1] }
  0x42   : > { %v3687_v21 = vcombine.low %v5162_v14, %v664_v15  ;;  %465 = vst [vmem:[#allocation2 + $0x40] sm:$0xf] %v464_v41  ;;  %v743_v46 = vor.u32 %v742_v37, %v738_v26  ;;  %468 = vst [vmem:[#allocation2 + $0x44] sm:$0x1] %v467_v44  ;;  %v530_v13 = vrot.slane %v528_v57, 1  ;;  %v537_v14 = vrot.slane %v535_v58, 1 }
  0x43   : > { %4495 = vmatpush3.bf16.msra.mxu1 %v4736_v50  ;;  %4211 = vmatpush3.bf16.msra.mxu0 %v4738_v62  ;;  %v5203_v50 = vld [vmem:[#allocation2 + $0x10] sm:$0xf]  ;;  %v581_v62 = vrot.slane %v5175_v25, 1  ;;  %v584_v26 = vrot.slane %v3677_v12, 1  ;;  %v478_v37 = vld [vmem:[#allocation2 + $0x24] sm:$0x1] }
  0x44   : > { %4496 = vmatprep.subr.bf16.mxu1 %v4739_v63  ;;  %4212 = vmatprep.subr.bf16.mxu0 %v4742_v1  ;;  %v745_v32 = vshrl.u32 %v3687_v21, 16  ;;  %v747_v33 = vshll.u32 %v3687_v21, 16  ;;  %v770_v34 = vrot.slane %v3687_v21, 1  ;;  %v526_v1 = vshrl.u32 %v5175_v25, 16  ;;  %v5244_v57 = vld [vmem:[#allocation2 + $0x30] sm:$0xf] }
  0x45   : > { %v3676_v8 = vcombine.low %v5203_v50, %v474_v54  ;;  %v538_v30 = vor.u32 %v537_v14, %v533_v2  ;;  %v482_v58 = vld [vmem:[#allocation2 + $0x34] sm:$0x1]  ;;  %v4772_v14 = vld [vmem:[%s5844_s1 + $0x218] sm:$0xff]  }
  0x46   : > { %v749_v42 = vrot.slane %v747_v33, 1  ;;  %v3746_v36 = vcombine.low %v769_v29, %v770_v34  ;;  %v531_v29 = vor.u32 %v530_v13, %v526_v1  ;;  %v549_v33 = vshll.u32 %v3677_v12, 16  ;;  %v4767_v13 = vld [vmem:[%s5844_s1 + $0x188] sm:$0xff]  }
  0x47   : > { %4497 = vmatpush3.bf16.msra.mxu1 %v4739_v63  ;;  %4213 = vmatpush3.bf16.msra.mxu0 %v4744_v17  ;;  %v582_v63 = vrot.slane %v5195_v45, 1  ;;  %v665_v3 = vld [vmem:[#allocation2 + $0x38] sm:$0xf]  ;;  %v666_v4 = vld [vmem:[#allocation2 + $0x3c] sm:$0x1]  ;;  %v583_v23 = vrot.slane %v3676_v8, 1  ;;  %v5249_v1 = vcombine.low %v5244_v57, %v482_v58 }
  0x48   : > { %4498 = vmatprep.subr.bf16.mxu1 %v4745_v22  ;;  %4214 = vmatprep.subr.bf16.mxu0 %v4746_v28  ;;  %v750_v48 = vor.u32 %v749_v42, %v745_v32  ;;  %v3688_v11 = vcombine.low %v665_v3, %v666_v4  ;;  %v542_v32 = vshll.u32 %v3676_v8, 16  ;;  %v3775_v42 = vcombine.low %v531_v29, %v538_v30  ;;  %v4764_v4 = vld [vmem:[%s5844_s1 + $0x180] sm:$0xff]   ;;  %v1446_v58 = vld [vmem:[#allocation2 + $0x3c] sm:$0x1] }
  0x49   : > { %4484 = vmatprep.mubr.bf16.mxu1 %v3746_v36  ;;  %v667_v5 = vld [vmem:[#allocation2 + $0x40] sm:$0xf]  ;;  %v668_v10 = vld [vmem:[#allocation2 + $0x44] sm:$0x1]  ;;  %v3776_v25 = vcombine.low %v581_v62, %v582_v63  ;;  %v3678_v36 = vcombine.low %v5235_v35, %v478_v37  ;;  %v540_v44 = vshrl.u32 %v3676_v8, 16  ;;  %v587_v8 = vrot.slane %v5249_v1, 1 }
  0x4a   : > { %v3745_v56 = vcombine.low %v743_v46, %v750_v48  ;;  %v3689_v15 = vcombine.low %v667_v5, %v668_v10  ;;  %v771_v16 = vrot.slane %v3688_v11, 1  ;;  %v752_v17 = vshrl.u32 %v3688_v11, 16  ;;  %v5246_v62 = vld [vmem:[#allocation2 + $0x38] sm:$0xf]  ;;  %v484_v63 = vld [vmem:[#allocation2 + $0x3c] sm:$0x1] }
  0x4b   : > { %4499 = vmatpush3.bf16.msra.mxu1 %v4745_v22  ;;  %4215 = vmatpush3.bf16.msra.mxu0 %v4747_v38  ;;  %v754_v18 = vshll.u32 %v3688_v11, 16  ;;  %v5237_v38 = vld [vmem:[#allocation2 + $0x28] sm:$0xf]  ;;  %v3747_v39 = vcombine.low %v665_v3, %v667_v5  ;;  %v544_v45 = vrot.slane %v542_v32, 1  ;;  %v547_v46 = vshrl.u32 %v3677_v12, 16 }
  0x4c   : > { %4500 = vmatprep.subr.bf16.mxu1 %v4748_v43  ;;  %4216 = vmatprep.subr.bf16.mxu0 %v4751_v47  ;;  %v772_v19 = vrot.slane %v3689_v15, 1  ;;  %v759_v21 = vshrl.u32 %v3689_v15, 16  ;;  %v761_v22 = vshll.u32 %v3689_v15, 16  ;;  %v551_v47 = vrot.slane %v549_v33, 1  ;;  %v4766_v5 = vld [vmem:[%s5844_s1 + $0x1c8] sm:$0xff]   ;;  %v4773_v33 = vld [vmem:[%s5844_s1 + $0x1d8] sm:$0xff]  }
  0x4d   : > { %1054 = vmatprep.mubr.bf16.mxu0 %v3745_v56  ;;  %v756_v24 = vrot.slane %v754_v18, 1  ;;  %v3779_v48 = vcombine.low %v583_v23, %v584_v26  ;;  %v545_v60 = vor.u32 %v544_v45, %v540_v44  ;;  %v5252_v2 = vcombine.low %v5246_v62, %v484_v63  ;;  %v5293_v30 = vld [vmem:[#allocation2 + $0x20] sm:$0xf]  ;;  %v5315_v44 = vld [vmem:[#allocation2 + $0x30] sm:$0xf] }
  0x4e   : > { %1055 = vmatmul.mubr.bf16.gmra.mrb[8].mxu0 %v3744_v51  ;;  %v3749_v27 = vcombine.low %v771_v16, %v772_v19  ;;  %v763_v28 = vrot.slane %v761_v22, 1  ;;  %v3774_v3 = vcombine.low %v5158_v6, %v5168_v20  ;;  %v4769_v16 = vld [vmem:[%s5844_s1 + $0x1d0] sm:$0xff]   ;;  %v5281_v22 = vld [vmem:[#allocation2 + $0x18] sm:$0xf]  ;;  %v3777_v32 = vcombine.low %v5203_v50, %v5213_v55  ;;  %v4775_v50 = vld [vmem:[%s5844_s1 + $0x220] sm:$0xff]  }
  0x4f   : > { %4501 = vmatpush3.bf16.msra.mxu1 %v4748_v43  ;;  %4217 = vmatpush3.bf16.msra.mxu0 %v4753_v49  ;;  %v757_v31 = vor.u32 %v756_v24, %v752_v17  ;;  %v3679_v43 = vcombine.low %v5237_v38, %v480_v40  ;;  %v585_v49 = vrot.slane %v3678_v36, 1  ;;  %v588_v6 = vrot.slane %v5252_v2, 1  ;;  %v5279_v19 = vld [vmem:[#allocation2 + $0x10] sm:$0xf]  ;;  %v1442_v40 = vld [vmem:[#allocation2 + $0x2c] sm:$0x1] }
  0x50   : > { %4502 = vmatprep.subr.bf16.mxu1 %v4754_v52  ;;  %4218 = vmatprep.subr.bf16.mxu0 %v4755_v53  ;;  %v764_v34 = vor.u32 %v763_v28, %v759_v21  ;;  %v556_v53 = vshll.u32 %v3678_v36, 16  ;;  %v570_v17 = vshll.u32 %v5249_v1, 16  ;;  %v577_v18 = vshll.u32 %v5252_v2, 16  ;;  %v1436_v21 = vld [vmem:[#allocation2 + $0x14] sm:$0x1]  ;;  %v4778_v63 = vld [vmem:[%s5844_s1 + $0x1e0] sm:$0xff]  }
  0x51   : > { %4485 = vmatmul.mubr.bf16.gmra.mrb[4].mxu1 %v3749_v27  ;;  %v586_v51 = vrot.slane %v3679_v43, 1  ;;  %v563_v54 = vshll.u32 %v3679_v43, 16  ;;  %v561_v10 = vshrl.u32 %v3679_v43, 16  ;;  %v3785_v15 = vcombine.low %v587_v8, %v588_v6  ;;  %v4771_v27 = vld [vmem:[%s5844_s1 + $0x190] sm:$0xff]  }
  0x52   : > { %4504 = vmatprep.mubr.bf16.mxu1 %v3776_v25  ;;  %v3748_v41 = vcombine.low %v757_v31, %v764_v34  ;;  %v558_v11 = vrot.slane %v556_v53, 1  ;;  %v1438_v25 = vld [vmem:[#allocation2 + $0x1c] sm:$0x1]  ;;  %v5284_v26 = vcombine.low %v5279_v19, %v1436_v21  ;;  %v568_v28 = vshrl.u32 %v5249_v1, 16  ;;  %v1440_v31 = vld [vmem:[#allocation2 + $0x24] sm:$0x1] }
  0x53   : > { %4503 = vmatpush3.bf16.msra.mxu1 %v4754_v52  ;;  %4219 = vmatpush3.bf16.msra.mxu0 %v4756_v61  ;;  %v4765_v52 = vld [vmem:[%s5844_s1 + $0x208] sm:$0xff]   ;;  %v3782_v56 = vcombine.low %v585_v49, %v586_v51  ;;  %v552_v61 = vor.u32 %v551_v47, %v547_v46  ;;  %v565_v12 = vrot.slane %v563_v54, 1  ;;  %v5291_v29 = vcombine.low %v5281_v22, %v1438_v25  ;;  %v5318_v49 = vld [vmem:[#allocation2 + $0x38] sm:$0xf] }
  0x54   : > { %4512 = vmatprep.subr.bf16.mxu1 %v5227_v7  ;;  %4256 = vmatprep.subr.bf16.mxu0 %v4762_v9  ;;  %v4768_v9 = vld [vmem:[%s5844_s1 + $0x210] sm:$0xff]   ;;  %v575_v34 = vshrl.u32 %v5252_v2, 16  ;;  %v1547_v37 = vrot.slane %v5284_v26, 1  ;;  %v572_v55 = vrot.slane %v570_v17, 1  ;;  %v1494_v43 = vshll.u32 %v5284_v26, 16  ;;  %v4774_v51 = vld [vmem:[%s5844_s1 + $0x198] sm:$0xff]  }
  0x55   : > { %1062 = vmatprep.mubr.bf16.mxu0 %v3748_v41  ;;  %v3778_v20 = vcombine.low %v545_v60, %v552_v61  ;;  %v566_v24 = vor.u32 %v565_v12, %v561_v10  ;;  %v5305_v41 = vcombine.low %v5293_v30, %v1440_v31  ;;  %v579_v46 = vrot.slane %v577_v18, 1  ;;  %v5331_v61 = vld [vmem:[#allocation2 + $0x40] sm:$0xf]  ;;  %v1450_v10 = vld [vmem:[#allocation2 + $0x4c] sm:$0x1] }
  0x56   : > { %1063 = vmatmul.mubr.bf16.gmra.mrb[12].mxu0 %v3747_v39  ;;  %v5302_v39 = vld [vmem:[#allocation2 + $0x28] sm:$0xf]  ;;  %v1501_v47 = vshll.u32 %v5291_v29, 16  ;;  %v1492_v54 = vshrl.u32 %v5284_v26, 16  ;;  %v573_v8 = vor.u32 %v572_v55, %v568_v28 }
  0x57   : > { %1336 = vmatprep.mubr.bf16.mxu0 %v3775_v42  ;;  %v1548_v42 = vrot.slane %v5291_v29, 1  ;;  %v1549_v1 = vrot.slane %v5305_v41, 1  ;;  %v1506_v12 = vshrl.u32 %v5305_v41, 16 }
  0x59   : > { %4505 = vmatmul.mubr.bf16.vlgmr.msra.gmra.mrb[0].mxu1 %v3779_v48  ;;  %v1444_v48 = vld [vmem:[#allocation2 + $0x34] sm:$0x1]  ;;  %v3868_v53 = vcombine.low %v1547_v37, %v1548_v42 }
  0x5a   : > { %4513 = vmatpush3.bf16.msra.mxu1 %v5227_v7  ;;  %4508 = vmatprep.mubr.bf16.mxu1 %v3782_v56  ;;  %v554_v7 = vshrl.u32 %v3678_v36, 16  ;;  %v5312_v36 = vcombine.low %v5302_v39, %v1442_v40  ;;  %v1499_v56 = vshrl.u32 %v5291_v29, 16  ;;  %v5329_v60 = vcombine.low %v5315_v44, %v1444_v48  ;;  %v4787_v42 = vld [vmem:[%s5844_s1 + $0x1f0] sm:$0xff]  }
  0x5b   : > { %4514 = vmatprep.subr.bf16.mxu1 %v4765_v52 }
  0x5c   : > { %v559_v23 = vor.u32 %v558_v11, %v554_v7  ;;  %v1550_v2 = vrot.slane %v5312_v36, 1  ;;  %v1503_v7 = vrot.slane %v1501_v47, 1  ;;  %v1515_v21 = vshll.u32 %v5312_v36, 16 }
  0x5d   : > { %v1513_v25 = vshrl.u32 %v5312_v36, 16  ;;  %v1520_v26 = vshrl.u32 %v5329_v60, 16  ;;  %v1522_v29 = vshll.u32 %v5329_v60, 16 }
  0x5e   : > { %1337 = vmatmul.mubr.bf16.vlgmr.msra.gmra.mrb[16].mxu0 %v3774_v3  ;;  %4515 = vmatpush3.bf16.msra.mxu1 %v4765_v52  ;;  %v3781_v45 = vcombine.low %v559_v23, %v566_v24  ;;  %v4781_v52 = vld [vmem:[%s5844_s1 + $0x228] sm:$0xff]   ;;  %v5339_v3 = vcombine.low %v5318_v49, %v1446_v58  ;;  %v3780_v23 = vcombine.low %v5235_v35, %v5237_v38  ;;  %v1517_v35 = vrot.slane %v1515_v21, 1  ;;  %v4791_v58 = vld [vmem:[%s5844_s1 + $0x1f8] sm:$0xff]  }
  0x5f   : > { %4257 = vmatpush3.bf16.msra.mxu0 %v4764_v4  ;;  %4516 = vmatprep.subr.bf16.mxu1 %v4768_v9  ;;  %v1448_v4 = vld [vmem:[#allocation2 + $0x44] sm:$0x1]  ;;  %v4782_v24 = vld [vmem:[%s5844_s1 + $0x1e8] sm:$0xff]   ;;  %v1524_v37 = vrot.slane %v1522_v29, 1  ;;  %v1504_v47 = vor.u32 %v1503_v7, %v1499_v56  ;;  %v4794_v56 = vld [vmem:[%s5844_s1 + $0x1b8] sm:$0xff]  }
  0x60   : > { %4258 = vmatprep.subr.bf16.mxu0 %v4766_v5  ;;  %1344 = vmatprep.mubr.bf16.mxu0 %v3778_v20  ;;  %v5341_v5 = vld [vmem:[#allocation2 + $0x48] sm:$0xf]  ;;  %v5344_v6 = vcombine.low %v5331_v61, %v1448_v4  ;;  %v580_v20 = vor.u32 %v579_v46, %v575_v34  ;;  %v1552_v17 = vrot.slane %v5339_v3, 1  ;;  %v1529_v31 = vshll.u32 %v5339_v3, 16  ;;  %v4790_v34 = vld [vmem:[%s5844_s1 + $0x238] sm:$0xff]  }
  0x61   : > { %4509 = vmatmul.mubr.bf16.gmra.mrb[4].mxu1 %v3785_v15  ;;  %v5347_v11 = vcombine.low %v5341_v5, %v1450_v10  ;;  %v4786_v15 = vld [vmem:[%s5844_s1 + $0x230] sm:$0xff]   ;;  %v1527_v40 = vshrl.u32 %v5339_v3, 16  ;;  %v3866_v3 = vcombine.low %v5279_v19, %v5281_v22  ;;  %v3872_v19 = vcombine.low %v5315_v44, %v5318_v49  ;;  %v4808_v44 = vld [vmem:[%s5846_s3 + $0x108] sm:$0xff]   ;;  %v4830_v29 = vld [vmem:[%s5846_s3 + $0x178] sm:$0xff]  }
  0x62   : > { %4517 = vmatpush3.bf16.msra.mxu1 %v4768_v9  ;;  %v1496_v9 = vrot.slane %v1494_v43, 1  ;;  %4528 = vmatprep.mubr.bf16.mxu1 %v3868_v53  ;;  %v1553_v18 = vrot.slane %v5344_v6, 1  ;;  %v1536_v38 = vshll.u32 %v5344_v6, 16  ;;  %v1534_v55 = vshrl.u32 %v5344_v6, 16  ;;  %v4805_v6 = vld [vmem:[%s5846_s3 + $0x100] sm:$0xff]   ;;  %v4809_v49 = vld [vmem:[%s5846_s3 + $0xc8] sm:$0xff]  }
  0x63   : > { %4259 = vmatpush3.bf16.msra.mxu0 %v4767_v13  ;;  %4518 = vmatprep.subr.bf16.mxu1 %v4772_v14  ;;  %v1508_v13 = vshll.u32 %v5305_v41, 16  ;;  %v1541_v43 = vshrl.u32 %v5347_v11, 16  ;;  %v3783_v53 = vcombine.low %v5244_v57, %v5246_v62  ;;  %v1525_v41 = vor.u32 %v1524_v37, %v1520_v26  ;;  %v4821_v21 = vld [vmem:[%s5846_s3 + $0xe8] sm:$0xff]   ;;  %v4825_v26 = vld [vmem:[%s5846_s3 + $0x170] sm:$0xff]  }
  0x64   : > { %4260 = vmatprep.subr.bf16.mxu0 %v4769_v16  ;;  %v1551_v16 = vrot.slane %v5329_v60, 1  ;;  %v1497_v46 = vor.u32 %v1496_v9, %v1492_v54  ;;  %v1538_v48 = vrot.slane %v1536_v38, 1  ;;  %v3871_v60 = vcombine.low %v1549_v1, %v1550_v2 }
  0x65   : > { %v1510_v28 = vrot.slane %v1508_v13, 1  ;;  %v3869_v1 = vcombine.low %v5293_v30, %v5302_v39  ;;  %v3875_v10 = vcombine.low %v5331_v61, %v5341_v5  ;;  %v4806_v30 = vld [vmem:[%s5846_s3 + $0xc0] sm:$0xff]   ;;  %v4810_v61 = vld [vmem:[%s5846_s3 + $0x148] sm:$0xff]   ;;  %v4811_v5 = vld [vmem:[%s5846_s3 + $0x110] sm:$0xff]  }
  0x66   : > { %1345 = vmatmul.mubr.bf16.gmra.mrb[20].mxu0 %v3777_v32  ;;  %4519 = vmatpush3.bf16.msra.mxu1 %v4772_v14  ;;  %v4780_v14 = vld [vmem:[%s5844_s1 + $0x1a0] sm:$0xff]   ;;  %v3784_v32 = vcombine.low %v573_v8, %v580_v20  ;;  %v3867_v54 = vcombine.low %v1497_v46, %v1504_v47  ;;  %v3874_v57 = vcombine.low %v1551_v16, %v1552_v17  ;;  %v4812_v20 = vld [vmem:[%s5846_s3 + $0xd0] sm:$0xff]   ;;  %v4815_v13 = vld [vmem:[%s5846_s3 + $0xd8] sm:$0xff]  }
  0x67   : > { %4261 = vmatpush3.bf16.msra.mxu0 %v4771_v27  ;;  %4520 = vmatprep.subr.bf16.mxu1 %v4775_v50  ;;  %v1554_v27 = vrot.slane %v5347_v11, 1  ;;  %v1511_v62 = vor.u32 %v1510_v28, %v1506_v12  ;;  %v1539_v9 = vor.u32 %v1538_v48, %v1534_v55  ;;  %v4807_v39 = vld [vmem:[%s5846_s3 + $0x140] sm:$0xff]   ;;  %v4814_v12 = vld [vmem:[%s5846_s3 + $0x118] sm:$0xff]  }
  0x68   : > { %4262 = vmatprep.subr.bf16.mxu0 %v4773_v33  ;;  %1352 = vmatprep.mubr.bf16.mxu0 %v3781_v45  ;;  %v4785_v33 = vld [vmem:[%s5844_s1 + $0x1a8] sm:$0xff]   ;;  %v1543_v45 = vshll.u32 %v5347_v11, 16  ;;  %v4813_v11 = vld [vmem:[%s5846_s3 + $0x150] sm:$0xff]   ;;  %v4818_v16 = vld [vmem:[%s5846_s3 + $0xe0] sm:$0xff]  }
  0x69   : > { %v3877_v8 = vcombine.low %v1553_v18, %v1554_v27  ;;  %v4819_v17 = vld [vmem:[%s5846_s3 + $0x160] sm:$0xff]   ;;  %v4820_v18 = vld [vmem:[%s5846_s3 + $0x128] sm:$0xff]   ;;  %v4826_v27 = vld [vmem:[%s5846_s3 + $0x138] sm:$0xff]  }
  0x6a   : > { %4521 = vmatpush3.bf16.msra.mxu1 %v4775_v50  ;;  %v1531_v50 = vrot.slane %v1529_v31, 1  ;;  %v4829_v28 = vld [vmem:[%s5846_s3 + $0xf8] sm:$0xff]   ;;  %v4831_v31 = vld [vmem:[%s5846_s3 + $0x40] sm:$0xff]  }
  0x6b   : > { %4263 = vmatpush3.bf16.msra.mxu0 %v4774_v51  ;;  %4522 = vmatprep.subr.bf16.mxu1 %v4781_v52  ;;  %v1545_v51 = vrot.slane %v1543_v45, 1 }
  0x6c   : > { %4264 = vmatprep.subr.bf16.mxu0 %v4778_v63  ;;  %v1518_v63 = vor.u32 %v1517_v35, %v1513_v25  ;;  %v1532_v36 = vor.u32 %v1531_v50, %v1527_v40  ;;  %v4824_v25 = vld [vmem:[%s5846_s3 + $0xf0] sm:$0xff]  }
  0x6d   : > { %v1546_v7 = vor.u32 %v1545_v51, %v1541_v43 }
  0x6e   : > { %1353 = vmatmul.mubr.bf16.gmra.mrb[24].mxu0 %v3780_v23  ;;  %4523 = vmatpush3.bf16.msra.mxu1 %v4781_v52  ;;  %v4789_v52 = vld [vmem:[%s5844_s1 + $0x1b0] sm:$0xff]   ;;  %v3870_v4 = vcombine.low %v1511_v62, %v1518_v63  ;;  %v3873_v2 = vcombine.low %v1525_v41, %v1532_v36  ;;  %v4822_v23 = vld [vmem:[%s5846_s3 + $0x168] sm:$0xff]  }
  0x6f   : > { %4265 = vmatpush3.bf16.msra.mxu0 %v4780_v14  ;;  %4524 = vmatprep.subr.bf16.mxu1 %v4786_v15  ;;  %v3876_v22 = vcombine.low %v1539_v9, %v1546_v7  ;;  %v4816_v14 = vld [vmem:[%s5846_s3 + $0x158] sm:$0xff]  }
  0x70   : > { %4266 = vmatprep.subr.bf16.mxu0 %v4782_v24  ;;  %1360 = vmatprep.mubr.bf16.mxu0 %v3784_v32  ;;  %v4823_v24 = vld [vmem:[%s5846_s3 + $0x130] sm:$0xff]   ;;  %v5486_v32 = vld [vmem:[%s5846_s3 + $0x80] sm:$0xff]  }
  0x72   : > { %4525 = vmatpush3.bf16.msra.mxu1 %v4786_v15  ;;  %v4817_v15 = vld [vmem:[%s5846_s3 + $0x120] sm:$0xff]  }
  0x73   : > { %4267 = vmatpush3.bf16.msra.mxu0 %v4785_v33  ;;  %4526 = vmatprep.subr.bf16.mxu1 %v4790_v34 }
  0x74   : > { %4268 = vmatprep.subr.bf16.mxu0 %v4787_v42 }
  0x76   : > { %1361 = vmatmul.mubr.bf16.gmra.mrb[28].mxu0 %v3783_v53  ;;  %4527 = vmatpush3.bf16.msra.mxu1 %v4790_v34 }
  0x77   : > { %4269 = vmatpush3.bf16.msra.mxu0 %v4789_v52  ;;  %1820 = vmatprep.mubr.bf16.mxu0 %v3867_v54 }
  0x78   : > { %4270 = vmatprep.subr.bf16.mxu0 %v4791_v58  ;;  %4536 = vmatprep.subr.bf16.mxu1 %v4807_v39 }
  0x79   : > { %4529 = vmatmul.mubr.bf16.vlgmr.msra.gmra.mrb[0].mxu1 %v3871_v60 }
  0x7a   : > { %4532 = vmatprep.mubr.bf16.mxu1 %v3874_v57  ;;  %4537 = vmatpush3.bf16.msra.mxu1 %v4807_v39 }
  0x7b   : > { %4271 = vmatpush3.bf16.msra.mxu0 %v4794_v56  ;;  %4538 = vmatprep.subr.bf16.mxu1 %v4810_v61 }
  0x7c   : > { %4308 = vmatprep.subr.bf16.mxu0 %v4805_v6 }
  0x7e   : > { %1821 = vmatmul.mubr.bf16.vlgmr.msra.gmra.mrb[32].mxu0 %v3866_v3  ;;  %4539 = vmatpush3.bf16.msra.mxu1 %v4810_v61 }
  0x7f   : > { %1828 = vmatprep.mubr.bf16.mxu0 %v3870_v4  ;;  %4309 = vmatpush3.bf16.msra.mxu0 %v4806_v30 }
  0x80   : > { %4310 = vmatprep.subr.bf16.mxu0 %v4808_v44  ;;  %4540 = vmatprep.subr.bf16.mxu1 %v4813_v11 }
  0x81   : > { %4533 = vmatmul.mubr.bf16.gmra.mrb[4].mxu1 %v3877_v8 }
  0x82   : > { %4541 = vmatpush3.bf16.msra.mxu1 %v4813_v11 }
  0x83   : > { %4311 = vmatpush3.bf16.msra.mxu0 %v4809_v49  ;;  %4542 = vmatprep.subr.bf16.mxu1 %v4816_v14 }
  0x84   : > { %4312 = vmatprep.subr.bf16.mxu0 %v4811_v5 }
  0x86   : > { %1829 = vmatmul.mubr.bf16.gmra.mrb[36].mxu0 %v3869_v1  ;;  %4543 = vmatpush3.bf16.msra.mxu1 %v4816_v14 }
  0x87   : > { %1836 = vmatprep.mubr.bf16.mxu0 %v3873_v2  ;;  %4313 = vmatpush3.bf16.msra.mxu0 %v4812_v20 }
  0x88   : > { %4314 = vmatprep.subr.bf16.mxu0 %v4814_v12  ;;  %4544 = vmatprep.subr.bf16.mxu1 %v4819_v17 }
  0x8a   : > { %4545 = vmatpush3.bf16.msra.mxu1 %v4819_v17 }
  0x8b   : > { %4315 = vmatpush3.bf16.msra.mxu0 %v4815_v13  ;;  %4546 = vmatprep.subr.bf16.mxu1 %v4822_v23 }
  0x8c   : > { %4316 = vmatprep.subr.bf16.mxu0 %v4817_v15 }
  0x8e   : > { %1837 = vmatmul.mubr.bf16.gmra.mrb[40].mxu0 %v3872_v19  ;;  %4547 = vmatpush3.bf16.msra.mxu1 %v4822_v23 }
  0x8f   : > { %1844 = vmatprep.mubr.bf16.mxu0 %v3876_v22  ;;  %4317 = vmatpush3.bf16.msra.mxu0 %v4818_v16 }
  0x90   : > { %4318 = vmatprep.subr.bf16.mxu0 %v4820_v18  ;;  %4548 = vmatprep.subr.bf16.mxu1 %v4825_v26 }
  0x92   : > { %4549 = vmatpush3.bf16.msra.mxu1 %v4825_v26 }
  0x93   : > { %4319 = vmatpush3.bf16.msra.mxu0 %v4821_v21  ;;  %4550 = vmatprep.subr.bf16.mxu1 %v4830_v29 }
  0x94   : > { %4320 = vmatprep.subr.bf16.mxu0 %v4823_v24 }
  0x96   : > { %1845 = vmatmul.mubr.bf16.gmra.mrb[44].mxu0 %v3875_v10  ;;  %4551 = vmatpush3.bf16.msra.mxu1 %v4830_v29 }
  0x97   : > { %4321 = vmatpush3.bf16.msra.mxu0 %v4824_v25  ;;  %4560 = vmatprep.subr.bf16.mxu1 %v5486_v32 }
  0x98   : > { %4322 = vmatprep.subr.bf16.mxu0 %v4826_v27 }
  0x9b   : > { %4323 = vmatpush3.bf16.msra.mxu0 %v4829_v28 }
  0x9c   : > { %4360 = vmatprep.subr.bf16.mxu0 %v4831_v31 }
 0x109   : > { %v4168_v35 = vpop.f32.mrb[0].mxu0 }
 0x10a   : > { %v4169_v38 = vpop.f32.mrb[1].mxu0 }
 0x10b   : > { %v4170_v33 = vadd.f32 %v4169_v38, %v4168_v35  ;;  %v4171_v34 = vpop.f32.mrb[2].mxu0 }
 0x10c   : > { %v4172_v37 = vpop.f32.mrb[3].mxu0 }
 0x10d   : > { %v4173_v40 = vadd.f32 %v4172_v37, %v4171_v34 }
 0x111   : > { %v4174_v50 = vpop.f32.mrb[4].mxu0 }
 0x112   : > { %v4175_v55 = vpop.f32.mrb[5].mxu0 }
 0x113   : > { %v4176_v42 = vadd.f32 %v4175_v55, %v4174_v50  ;;  %v4177_v43 = vpop.f32.mrb[6].mxu0 }
 0x114   : > { %v4178_v45 = vpop.f32.mrb[7].mxu0 }
 0x115   : > { %v4179_v46 = vadd.f32 %v4178_v45, %v4177_v43 }
 0x121   : > { %v4180_v47 = vpop.f32.mrb[8].mxu0 }
 0x122   : > { %v4181_v48 = vpop.f32.mrb[9].mxu0 }
 0x123   : > { %v4182_v51 = vadd.f32 %v4181_v48, %v4180_v47  ;;  %v4183_v52 = vpop.f32.mrb[10].mxu0 }
 0x124   : > { %v4184_v53 = vpop.f32.mrb[11].mxu0 }
 0x125   : > { %v4185_v58 = vadd.f32 %v4184_v53, %v4183_v52 }
 0x129   : > { %v4186_v54 = vpop.f32.mrb[12].mxu0 }
 0x12a   : > { %v4187_v56 = vpop.f32.mrb[13].mxu0 }
 0x12b   : > { %v4188_v60 = vadd.f32 %v4187_v56, %v4186_v54  ;;  %v4189_v57 = vpop.f32.mrb[14].mxu0 }
 0x12c   : > { %v4190_v62 = vpop.f32.mrb[15].mxu0 }
 0x12d   : > { %v4191_v63 = vadd.f32 %v4190_v62, %v4189_v57 }
 0x131   : > { %v4220_v3 = vpop.f32.mrb[16].mxu0 }
 0x132   : > { %v4221_v4 = vpop.f32.mrb[17].mxu0 }
 0x133   : > { %v4222_v8 = vadd.f32 %v4221_v4, %v4220_v3  ;;  %v4223_v41 = vpop.f32.mrb[18].mxu0 }
 0x134   : > { %v4224_v36 = vpop.f32.mrb[19].mxu0 }
 0x135   : > { %v4611_v1 = vadd.f32 %v4222_v8, %v4170_v33  ;;  %v4225_v2 = vadd.f32 %v4224_v36, %v4223_v41 }
 0x137   : > { %v4617_v9 = vadd.f32 %v4225_v2, %v4173_v40 }
 0x139   : > { %v4226_v7 = vpop.f32.mrb[20].mxu0 }
 0x13a   : > { %v4227_v19 = vpop.f32.mrb[21].mxu0 }
 0x13b   : > { %v4228_v22 = vadd.f32 %v4227_v19, %v4226_v7  ;;  %v4229_v10 = vpop.f32.mrb[22].mxu0 }
 0x13c   : > { %v4230_v6 = vpop.f32.mrb[23].mxu0 }
 0x13d   : > { %v4608_v30 = vadd.f32 %v4228_v22, %v4176_v42  ;;  %v4231_v39 = vadd.f32 %v4230_v6, %v4229_v10  ;;  %v5502_v42 = vld [vmem:[%s5845_s2] ss:$0 sm:$0xff]  ;;  %v2074_v10 = vld [vmem:[#allocation3 + $0x8] sm:$0xf]  ;;  %v2077_v6 = vld [vmem:[#allocation3 + $0xc] sm:$0x1] }
 0x13f   : > { %v4614_v44 = vadd.f32 %v4231_v39, %v4179_v46 }
 0x141   : > { %v4232_v49 = vpop.f32.mrb[24].mxu0 }
 0x142   : > { %v4233_v61 = vpop.f32.mrb[25].mxu0 }
 0x143   : > { %v4234_v5 = vadd.f32 %v4233_v61, %v4232_v49  ;;  %v4235_v20 = vpop.f32.mrb[26].mxu0 }
 0x144   : > { %v4236_v11 = vpop.f32.mrb[27].mxu0 }
 0x145   : > { %v5489_v12 = vadd.f32 %v4234_v5, %v4182_v51  ;;  %v4237_v13 = vadd.f32 %v4236_v11, %v4235_v20 }
 0x147   : > { %v5491_v14 = vadd.f32 %v4237_v13, %v4185_v58 }
 0x149   : > { %v4238_v15 = vpop.f32.mrb[28].mxu0 }
 0x14a   : > { %v4239_v16 = vpop.f32.mrb[29].mxu0 }
 0x14b   : > { %v4240_v17 = vadd.f32 %v4239_v16, %v4238_v15  ;;  %v4241_v18 = vpop.f32.mrb[30].mxu0  ;;  %v2080_v15 = vld [vmem:[#allocation3 + $0x10] sm:$0xf]  ;;  %v2083_v16 = vld [vmem:[#allocation3 + $0x14] sm:$0x1] }
 0x14c   : > { %v4242_v21 = vpop.f32.mrb[31].mxu0  ;;  %v4530_v23 = vpop.f32.mrb[0].mxu1 }
 0x14d   : > { %v5493_v24 = vadd.f32 %v4240_v17, %v4188_v60  ;;  %v4243_v25 = vadd.f32 %v4242_v21, %v4241_v18  ;;  %v1887_v26 = vpop.f32.mrb[1].mxu1 }
 0x14e   : > { %v4531_v27 = vpop.f32.mrb[2].mxu1 }
 0x14f   : > { %v5495_v28 = vadd.f32 %v4243_v25, %v4191_v63  ;;  %v1890_v29 = vpop.f32.mrb[3].mxu1 }
 0x151   : > { %v4272_v31 = vpop.f32.mrb[32].mxu0 }
 0x152   : > { %v4273_v35 = vpop.f32.mrb[33].mxu0 }
 0x153   : > { %v4274_v38 = vadd.f32 %v4273_v35, %v4272_v31  ;;  %v4275_v33 = vpop.f32.mrb[34].mxu0 }
 0x154   : > { %v4276_v34 = vpop.f32.mrb[35].mxu0  ;;  %v5497_v37 = vpop.f32.mrb[4].mxu1 }
 0x155   : > { %v4612_v40 = vadd.f32 %v4611_v1, %v4274_v38  ;;  %v4277_v50 = vadd.f32 %v4276_v34, %v4275_v33  ;;  %v1903_v55 = vpop.f32.mrb[5].mxu1 }
 0x156   : > { %v5504_v43 = vpop.f32.mrb[6].mxu1 }
 0x157   : > { %v4613_v45 = vadd.f32 %v4612_v40, %v1887_v26  ;;  %v4618_v46 = vadd.f32 %v4617_v9, %v4277_v50  ;;  %v5506_v47 = vpop.f32.mrb[7].mxu1 }
 0x159   : > { %v1933_v48 = vadd.f32 %v4613_v45, %v5502_v42  ;;  %v4619_v51 = vadd.f32 %v4618_v46, %v1890_v29  ;;  %v4278_v52 = vpop.f32.mrb[36].mxu0 }
 0x15a   : > { %v4279_v53 = vpop.f32.mrb[37].mxu0 }
 0x15b   : > { %v1941_v58 = vmax.f32 %v1933_v48, 0.0  ;;  %v1934_v54 = vadd.f32 %v4619_v51, %v5502_v42  ;;  %v4280_v56 = vadd.f32 %v4279_v53, %v4278_v52  ;;  %v4281_v60 = vpop.f32.mrb[38].mxu0 }
 0x15c   : > { %v4282_v57 = vpop.f32.mrb[39].mxu0 }
 0x15d   : > { %v4144_v62 = vpack.c.bf16 %v1941_v58, %v1941_v58  ;;  %v1942_v63 = vmax.f32 %v1934_v54, 0.0  ;;  %v4609_v3 = vadd.f32 %v4608_v30, %v4280_v56  ;;  %v4283_v4 = vadd.f32 %v4282_v57, %v4281_v60  ;;  %v2086_v58 = vld [vmem:[#allocation3 + $0x18] sm:$0xf]  ;;  %v2089_v54 = vld [vmem:[#allocation3 + $0x1c] sm:$0x1] }
 0x15f   : > { %v1994_v8 = vshrl.u32 %v4144_v62, 16  ;;  %v4145_v41 = vpack.c.bf16 %v1942_v63, %v1942_v63  ;;  %v4610_v36 = vadd.f32 %v4609_v3, %v4530_v23  ;;  %v4615_v1 = vadd.f32 %v4614_v44, %v4283_v4 }
 0x160   : > { %v1997_v9 = vshll.u32 %v4144_v62, 16 }
 0x161   : > { %v1996_v2 = vrot.slane %v1994_v8, 7  ;;  %v2002_v7 = vshrl.u32 %v4145_v41, 16  ;;  %v1935_v19 = vadd.f32 %v4610_v36, %v5502_v42  ;;  %v4284_v22 = vpop.f32.mrb[40].mxu0  ;;  %v2005_v39 = vshll.u32 %v4145_v41, 16  ;;  %v2095_v41 = vld [vmem:[#allocation3 + $0x24] sm:$0x1] }
 0x162   : > { %v4616_v49 = vadd.f32 %v4615_v1, %v4531_v27  ;;  %v4285_v61 = vpop.f32.mrb[41].mxu0 }
 0x163   : > { %v1999_v5 = vor.u32 %v1997_v9, %v1996_v2  ;;  %v2000_v20 = vrot.slane %v1996_v2, 4  ;;  %v2004_v11 = vrot.slane %v2002_v7, 7  ;;  %v1943_v30 = vmax.f32 %v1935_v19, 0.0  ;;  %v4287_v13 = vpop.f32.mrb[42].mxu0 }
 0x164   : > { %v1936_v44 = vadd.f32 %v4616_v49, %v5502_v42  ;;  %v4286_v17 = vadd.f32 %v4285_v61, %v4284_v22  ;;  %v4288_v18 = vpop.f32.mrb[43].mxu0 }
 0x165   : > { %v2075_v21 = vsel %vm5063_vm4, %v1999_v5, %v2074_v10  ;;  %v2078_v23 = vsel %vm5069_vm5, %v2000_v20, %v2077_v6  ;;  %v2007_v25 = vor.u32 %v2005_v39, %v2004_v11  ;;  %v2008_v26 = vrot.slane %v2004_v11, 4 }
 0x166   : > { %2076 = vst [vmem:[#allocation3 + $0x8] sm:$0xf] %v2075_v21  ;;  %2079 = vst [vmem:[#allocation3 + $0xc] sm:$0x1] %v2078_v23  ;;  %v4146_v27 = vpack.c.bf16 %v1943_v30, %v1943_v30  ;;  %v1944_v29 = vmax.f32 %v1936_v44, 0.0  ;;  %v4624_v31 = vadd.f32 %v5489_v12, %v4286_v17  ;;  %v4289_v35 = vadd.f32 %v4288_v18, %v4287_v13 }
 0x167   : > { %v2081_v38 = vsel %vm5063_vm4, %v2007_v25, %v2080_v15  ;;  %v2084_v33 = vsel %vm5069_vm5, %v2008_v26, %v2083_v16 }
 0x168   : > { %2082 = vst [vmem:[#allocation3 + $0x10] sm:$0xf] %v2081_v38  ;;  %2085 = vst [vmem:[#allocation3 + $0x14] sm:$0x1] %v2084_v33  ;;  %v2010_v34 = vshrl.u32 %v4146_v27, 16  ;;  %v4147_v40 = vpack.c.bf16 %v1944_v29, %v1944_v29  ;;  %v4625_v50 = vadd.f32 %v4624_v31, %v1903_v55  ;;  %v4630_v45 = vadd.f32 %v5491_v14, %v4289_v35 }
 0x169   : > { %v4290_v46 = vpop.f32.mrb[44].mxu0  ;;  %v2013_v51 = vshll.u32 %v4146_v27, 16  ;;  %v2092_v55 = vld [vmem:[#allocation3 + $0x20] sm:$0xf]  ;;  %v2098_v27 = vld [vmem:[#allocation3 + $0x28] sm:$0xf] }
 0x16a   : > { %v2012_v48 = vrot.slane %v2010_v34, 7  ;;  %v2018_v52 = vshrl.u32 %v4147_v40, 16  ;;  %v1937_v12 = vadd.f32 %v4625_v50, %v5502_v42  ;;  %v4291_v53 = vpop.f32.mrb[45].mxu0  ;;  %v2021_v56 = vshll.u32 %v4147_v40, 16  ;;  %v2101_v29 = vld [vmem:[#allocation3 + $0x2c] sm:$0x1] }
 0x16b   : > { %v4631_v60 = vadd.f32 %v4630_v45, %v5506_v47  ;;  %v4292_v57 = vadd.f32 %v4291_v53, %v4290_v46  ;;  %v4293_v62 = vpop.f32.mrb[46].mxu0  ;;  %v2104_v45 = vld [vmem:[#allocation3 + $0x30] sm:$0xf]  ;;  %v2107_v46 = vld [vmem:[#allocation3 + $0x34] sm:$0x1] }
 0x16c   : > { %v2015_v63 = vor.u32 %v2013_v51, %v2012_v48  ;;  %v2016_v3 = vrot.slane %v2012_v48, 4  ;;  %v2020_v4 = vrot.slane %v2018_v52, 7  ;;  %v1945_v8 = vmax.f32 %v1937_v12, 0.0  ;;  %v4294_v14 = vpop.f32.mrb[47].mxu0 }
 0x16d   : > { %v1938_v36 = vadd.f32 %v4631_v60, %v5502_v42  ;;  %v4621_v1 = vadd.f32 %v5493_v24, %v4292_v57  ;;  %v4295_v2 = vadd.f32 %v4294_v14, %v4293_v62  ;;  %v5526_v9 = vld [vmem:[#allocation3 + $0x8] sm:$0xf]  ;;  %v2307_v7 = vld [vmem:[#allocation3 + $0xc] sm:$0x1] }
 0x16e   : > { %v2087_v47 = vsel %vm5063_vm4, %v2015_v63, %v2086_v58  ;;  %v2090_v19 = vsel %vm5069_vm5, %v2016_v3, %v2089_v54  ;;  %v2023_v22 = vor.u32 %v2021_v56, %v2020_v4  ;;  %v2024_v10 = vrot.slane %v2020_v4, 4 }
 0x16f   : > { %2088 = vst [vmem:[#allocation3 + $0x18] sm:$0xf] %v2087_v47  ;;  %2091 = vst [vmem:[#allocation3 + $0x1c] sm:$0x1] %v2090_v19  ;;  %v4148_v6 = vpack.c.bf16 %v1945_v8, %v1945_v8  ;;  %v1946_v39 = vmax.f32 %v1938_v36, 0.0  ;;  %v4622_v49 = vadd.f32 %v4621_v1, %v5497_v37  ;;  %v4627_v24 = vadd.f32 %v5495_v28, %v4295_v2 }
 0x170   : > { %v5534_v61 = vld [vmem:[#allocation3 + $0x10] sm:$0xf]  ;;  %v2309_v5 = vld [vmem:[#allocation3 + $0x14] sm:$0x1]  ;;  %v2093_v20 = vsel %vm5063_vm4, %v2023_v22, %v2092_v55  ;;  %v2096_v11 = vsel %vm5069_vm5, %v2024_v10, %v2095_v41  ;;  %v3919_v30 = vcombine.low %v5526_v9, %v2307_v7  ;;  %v2110_v2 = vld [vmem:[#allocation3 + $0x38] sm:$0xf] }
 0x171   : > { %v3920_v13 = vcombine.low %v5534_v61, %v2309_v5  ;;  %2094 = vst [vmem:[#allocation3 + $0x20] sm:$0xf] %v2093_v20  ;;  %2097 = vst [vmem:[#allocation3 + $0x24] sm:$0x1] %v2096_v11  ;;  %v2026_v15 = vshrl.u32 %v4148_v6, 16  ;;  %v4149_v16 = vpack.c.bf16 %v1946_v39, %v1946_v39  ;;  %v1939_v37 = vadd.f32 %v4622_v49, %v5502_v42 }
 0x172   : > { %v2029_v28 = vshll.u32 %v4148_v6, 16  ;;  %v4628_v44 = vadd.f32 %v4627_v24, %v5504_v43  ;;  %v2418_v17 = vrot.slane %v3919_v30, 1  ;;  %v2363_v26 = vshrl.u32 %v3919_v30, 16  ;;  %v2113_v19 = vld [vmem:[#allocation3 + $0x3c] sm:$0x1] }
 0x173   : > { %v2419_v18 = vrot.slane %v3920_v13, 1  ;;  %v2028_v21 = vrot.slane %v2026_v15, 7  ;;  %v2034_v23 = vshrl.u32 %v4149_v16, 16  ;;  %v1947_v25 = vmax.f32 %v1939_v37, 0.0  ;;  %v2116_v5 = vld [vmem:[#allocation3 + $0x40] sm:$0xf] }
 0x174   : > { %v2037_v31 = vshll.u32 %v4149_v16, 16  ;;  %v1940_v35 = vadd.f32 %v4628_v44, %v5502_v42  ;;  %v2365_v33 = vshll.u32 %v3919_v30, 16  ;;  %v2370_v52 = vshrl.u32 %v3920_v13, 16  ;;  %v2119_v11 = vld [vmem:[#allocation3 + $0x44] sm:$0x1] }
 0x175   : > { %v3977_v38 = vcombine.low %v2418_v17, %v2419_v18  ;;  %v2031_v34 = vor.u32 %v2029_v28, %v2028_v21  ;;  %v2032_v40 = vrot.slane %v2028_v21, 4  ;;  %v2036_v50 = vrot.slane %v2034_v23, 7  ;;  %v4837_v21 = vld [vmem:[%s5846_s3 + $0x48] sm:$0xff]  }
 0x176   : > { %v4150_v48 = vpack.c.bf16 %v1947_v25, %v1947_v25  ;;  %v1948_v43 = vmax.f32 %v1940_v35, 0.0  ;;  %v2367_v51 = vrot.slane %v2365_v33, 1  ;;  %v2372_v12 = vshll.u32 %v3920_v13, 16  ;;  %v5545_v53 = vld [vmem:[#allocation3 + $0x18] sm:$0xf]  ;;  %v4833_v13 = vld [vmem:[%s5846_s3] sm:$0xff]  }
 0x177   : > { %4552 = vmatprep.mubr.bf16.mxu1 %v3977_v38  ;;  %v2099_v58 = vsel %vm5063_vm4, %v2031_v34, %v2098_v27  ;;  %v2102_v42 = vsel %vm5069_vm5, %v2032_v40, %v2101_v29  ;;  %v2039_v54 = vor.u32 %v2037_v31, %v2036_v50  ;;  %v2040_v56 = vrot.slane %v2036_v50, 4  ;;  %v2311_v60 = vld [vmem:[#allocation3 + $0x1c] sm:$0x1] }
 0x178   : > { %2100 = vst [vmem:[#allocation3 + $0x28] sm:$0xf] %v2099_v58  ;;  %2103 = vst [vmem:[#allocation3 + $0x2c] sm:$0x1] %v2102_v42  ;;  %v2042_v57 = vshrl.u32 %v4150_v48, 16  ;;  %v2045_v62 = vshll.u32 %v4150_v48, 16  ;;  %v4151_v63 = vpack.c.bf16 %v1948_v43, %v1948_v43  ;;  %v3975_v3 = vcombine.low %v5526_v9, %v5534_v61 }
 0x179   : > { %v5553_v4 = vld [vmem:[#allocation3 + $0x20] sm:$0xf]  ;;  %v2313_v55 = vld [vmem:[#allocation3 + $0x24] sm:$0x1]  ;;  %v2105_v8 = vsel %vm5063_vm4, %v2039_v54, %v2104_v45  ;;  %v2108_v14 = vsel %vm5069_vm5, %v2040_v56, %v2107_v46  ;;  %v2374_v41 = vrot.slane %v2372_v12, 1  ;;  %v3921_v36 = vcombine.low %v5545_v53, %v2311_v60  ;;  %v4839_v23 = vld [vmem:[%s5846_s3 + $0x88] sm:$0xff]  }
 0x17a   : > { %2106 = vst [vmem:[#allocation3 + $0x30] sm:$0xf] %v2105_v8  ;;  %2109 = vst [vmem:[#allocation3 + $0x34] sm:$0x1] %v2108_v14  ;;  %v2044_v1 = vrot.slane %v2042_v57, 7  ;;  %v2050_v7 = vshrl.u32 %v4151_v63, 16  ;;  %v2368_v47 = vor.u32 %v2367_v51, %v2363_v26  ;;  %v3922_v9 = vcombine.low %v5553_v4, %v2313_v55 }
 0x17b   : > { %v2053_v22 = vshll.u32 %v4151_v63, 16  ;;  %v2375_v10 = vor.u32 %v2374_v41, %v2370_v52  ;;  %v2420_v6 = vrot.slane %v3921_v36, 1  ;;  %v2379_v39 = vshll.u32 %v3921_v36, 16  ;;  %v4838_v34 = vld [vmem:[%s5846_s3 + $0x8] sm:$0xff]   ;;  %v5591_v43 = vld [vmem:[#allocation3] sm:$0xf] }
 0x17c   : > { %v2047_v49 = vor.u32 %v2045_v62, %v2044_v1  ;;  %v2048_v24 = vrot.slane %v2044_v1, 4  ;;  %v2052_v61 = vrot.slane %v2050_v7, 7  ;;  %v2421_v20 = vrot.slane %v3922_v9, 1  ;;  %v2123_v51 = vld [vmem:[#allocation3 + $0x4] sm:$0x1]  ;;  %v4846_v63 = vld [vmem:[%s5846_s3 + $0x58] sm:$0xff]  }
 0x17d   : > { %v3976_v30 = vcombine.low %v2368_v47, %v2375_v10  ;;  %v2377_v15 = vshrl.u32 %v3921_v36, 16  ;;  %v2381_v16 = vrot.slane %v2379_v39, 1  ;;  %v2386_v37 = vshll.u32 %v3922_v9, 16  ;;  %v4843_v12 = vld [vmem:[%s5846_s3 + $0x90] sm:$0xff]   ;;  %v5596_v58 = vld [vmem:[#allocation3 + $0x8] sm:$0xf] }
 0x17e   : > { %v2111_v28 = vsel %vm5063_vm4, %v2047_v49, %v2110_v2  ;;  %v2114_v44 = vsel %vm5069_vm5, %v2048_v24, %v2113_v19  ;;  %v2055_v17 = vor.u32 %v2053_v22, %v2052_v61  ;;  %v2056_v18 = vrot.slane %v2052_v61, 4  ;;  %v2125_v42 = vld [vmem:[#allocation3 + $0xc] sm:$0x1]  ;;  %v4842_v62 = vld [vmem:[%s5846_s3 + $0x10] sm:$0xff]   ;;  %v4849_v24 = vld [vmem:[%s5846_s3 + $0x60] sm:$0xff]  }
 0x17f   : > { %2112 = vst [vmem:[#allocation3 + $0x38] sm:$0xf] %v2111_v28  ;;  %2115 = vst [vmem:[#allocation3 + $0x3c] sm:$0x1] %v2114_v44  ;;  %2691 = vmatprep.mubr.bf16.mxu0 %v3976_v30  ;;  %v3980_v25 = vcombine.low %v2420_v6, %v2421_v20  ;;  %v2384_v26 = vshrl.u32 %v3922_v9, 16  ;;  %v2388_v27 = vrot.slane %v2386_v37, 1  ;;  %v2382_v40 = vor.u32 %v2381_v16, %v2377_v15 }
 0x180   : > { %v5574_v29 = vld [vmem:[#allocation3 + $0x28] sm:$0xf]  ;;  %v2315_v31 = vld [vmem:[#allocation3 + $0x2c] sm:$0x1]  ;;  %v2117_v35 = vsel %vm5063_vm4, %v2055_v17, %v2116_v5  ;;  %v2120_v38 = vsel %vm5069_vm5, %v2056_v18, %v2119_v11  ;;  %2692 = vmatmul.mubr.bf16.vlgmr.msra.gmra.mrb[48].mxu0 %v3975_v3  ;;  %v3978_v57 = vcombine.low %v5545_v53, %v5553_v4  ;;  %v5607_v55 = vcombine.low %v5591_v43, %v2123_v51  ;;  %v4852_v11 = vld [vmem:[%s5846_s3 + $0xa0] sm:$0xff]  }
 0x181   : > { %v3923_v33 = vcombine.low %v5574_v29, %v2315_v31  ;;  %2118 = vst [vmem:[#allocation3 + $0x40] sm:$0xf] %v2117_v35  ;;  %2121 = vst [vmem:[#allocation3 + $0x44] sm:$0x1] %v2120_v38  ;;  %4361 = vmatpush3.bf16.msra.mxu0 %v4833_v13  ;;  %4553 = vmatmul.mubr.bf16.vlgmr.msra.gmra.mrb[8].mxu1 %v3980_v25  ;;  %v2389_v50 = vor.u32 %v2388_v27, %v2384_v26  ;;  %v5584_v45 = vld [vmem:[#allocation3 + $0x30] sm:$0xf] }
 0x182   : > { %v2317_v59 = vld [vmem:[#allocation3 + $0x34] sm:$0x1]  ;;  %4362 = vmatprep.subr.bf16.mxu0 %v4837_v21  ;;  %4561 = vmatpush3.bf16.msra.mxu1 %v5486_v32  ;;  %v5612_v4 = vcombine.low %v5596_v58, %v2125_v42  ;;  %v4848_v1 = vld [vmem:[%s5846_s3 + $0x98] sm:$0xff]   ;;  %v2234_v6 = vrot.slane %v5607_v55, 1  ;;  %v2181_v5 = vshll.u32 %v5607_v55, 16  ;;  %v2179_v37 = vshrl.u32 %v5607_v55, 16 }
 0x183   : > { %v3924_v46 = vcombine.low %v5584_v45, %v2317_v59  ;;  %v2393_v48 = vshll.u32 %v3923_v33, 16  ;;  %4562 = vmatprep.subr.bf16.mxu1 %v4839_v23  ;;  %v3979_v52 = vcombine.low %v2382_v40, %v2389_v50  ;;  %v2422_v32 = vrot.slane %v3923_v33, 1  ;;  %v4847_v22 = vld [vmem:[%s5846_s3 + $0x18] sm:$0xff]   ;;  %v5635_v28 = vld [vmem:[#allocation3 + $0x18] sm:$0xf]  ;;  %v4851_v17 = vld [vmem:[%s5846_s3 + $0x20] sm:$0xff]  }
 0x184   : > { %v2391_v3 = vshrl.u32 %v3923_v33, 16  ;;  %v2235_v61 = vrot.slane %v5612_v4, 1  ;;  %v2188_v20 = vshll.u32 %v5612_v4, 16  ;;  %v2129_v44 = vld [vmem:[#allocation3 + $0x1c] sm:$0x1]  ;;  %v3981_v26 = vcombine.low %v5574_v29, %v5584_v45  ;;  %v4860_v51 = vld [vmem:[%s5846_s3 + $0x70] sm:$0xff]  }
 0x185   : > { %v2423_v54 = vrot.slane %v3924_v46, 1  ;;  %v2395_v56 = vrot.slane %v2393_v48, 1  ;;  %v2400_v60 = vshll.u32 %v3924_v46, 16  ;;  %4363 = vmatpush3.bf16.msra.mxu0 %v4838_v34  ;;  %2699 = vmatprep.mubr.bf16.mxu0 %v3979_v52  ;;  %v2398_v14 = vshrl.u32 %v3924_v46, 16  ;;  %v4855_v27 = vld [vmem:[%s5846_s3 + $0x68] sm:$0xff]   ;;  %v4863_v42 = vld [vmem:[%s5846_s3 + $0xb0] sm:$0xff]  }
 0x186   : > { %4364 = vmatprep.subr.bf16.mxu0 %v4840_v0  ;;  %4563 = vmatpush3.bf16.msra.mxu1 %v4839_v23  ;;  %v5609_v36 = vld [vmem:[#allocation3 + $0x38] sm:$0xf]  ;;  %v2319_v53 = vld [vmem:[#allocation3 + $0x3c] sm:$0x1]  ;;  %v4013_v31 = vcombine.low %v2234_v6, %v2235_v61  ;;  %v2183_v35 = vrot.slane %v2181_v5, 1  ;;  %v2190_v59 = vrot.slane %v2188_v20, 1  ;;  %v5651_v29 = vcombine.low %v5635_v28, %v2129_v44 }
 0x187   : > { %v3983_v8 = vcombine.low %v2422_v32, %v2423_v54  ;;  %v2402_v41 = vrot.slane %v2400_v60, 1  ;;  %4564 = vmatprep.subr.bf16.mxu1 %v4843_v12  ;;  %v3925_v2 = vcombine.low %v5609_v36, %v2319_v53  ;;  %v2396_v7 = vor.u32 %v2395_v56, %v2391_v3  ;;  %v5645_v38 = vld [vmem:[#allocation3 + $0x10] sm:$0xf]  ;;  %v2127_v33 = vld [vmem:[#allocation3 + $0x14] sm:$0x1]  ;;  %v4859_v34 = vld [vmem:[%s5846_s3 + $0xa8] sm:$0xff]  }
 0x188   : > { %2700 = vmatmul.mubr.bf16.gmra.mrb[52].mxu0 %v3978_v57  ;;  %v5618_v9 = vld [vmem:[#allocation3 + $0x40] sm:$0xf]  ;;  %v2321_v19 = vld [vmem:[#allocation3 + $0x44] sm:$0x1]  ;;  %v4856_v45 = vld [vmem:[%s5846_s3 + $0x28] sm:$0xff]   ;;  %v2186_v46 = vshrl.u32 %v5612_v4, 16  ;;  %v5658_v48 = vcombine.low %v5645_v38, %v2127_v33  ;;  %v2184_v52 = vor.u32 %v2183_v35, %v2179_v37 }
 0x189   : > { %4556 = vmatprep.mubr.bf16.mxu1 %v3983_v8  ;;  %v2403_v47 = vor.u32 %v2402_v41, %v2398_v14  ;;  %4365 = vmatpush3.bf16.msra.mxu0 %v4842_v62  ;;  %v3926_v10 = vcombine.low %v5618_v9, %v2321_v19  ;;  %v2407_v39 = vshll.u32 %v3925_v2, 16  ;;  %v2424_v30 = vrot.slane %v3925_v2, 1  ;;  %v5667_v54 = vld [vmem:[#allocation3 + $0x28] sm:$0xf]  ;;  %v2133_v56 = vld [vmem:[#allocation3 + $0x2c] sm:$0x1] }
 0x18a   : > { %4366 = vmatprep.subr.bf16.mxu0 %v4846_v63  ;;  %4565 = vmatpush3.bf16.msra.mxu1 %v4843_v12  ;;  %v2405_v21 = vshrl.u32 %v3925_v2, 16  ;;  %v2191_v12 = vor.u32 %v2190_v59, %v2186_v46  ;;  %v2202_v32 = vshll.u32 %v5651_v29, 16  ;;  %v4862_v60 = vld [vmem:[%s5846_s3 + $0x30] sm:$0xff]   ;;  %v2195_v57 = vshll.u32 %v5658_v48, 16  ;;  %v4864_v63 = vld [vmem:[%s5846_s3 + $0x78] sm:$0xff]   ;;  %v4872_v19 = vld [vmem:[%s5846_s3 + $0x200] sm:$0xff]  }
 0x18b   : > { %v3982_v49 = vcombine.low %v2396_v7, %v2403_v47  ;;  %4566 = vmatprep.subr.bf16.mxu1 %v4848_v1  ;;  %v2425_v13 = vrot.slane %v3926_v10, 1  ;;  %v2409_v15 = vrot.slane %v2407_v39, 1  ;;  %v2414_v16 = vshll.u32 %v3926_v10, 16  ;;  %v5678_v3 = vld [vmem:[#allocation3 + $0x20] sm:$0xf]  ;;  %v4866_v14 = vld [vmem:[%s5846_s3 + $0xb8] sm:$0xff]  }
 0x18c   : > { %v2412_v23 = vshrl.u32 %v3926_v10, 16  ;;  %v3984_v62 = vcombine.low %v5609_v36, %v5618_v9  ;;  %v2131_v55 = vld [vmem:[#allocation3 + $0x24] sm:$0x1]  ;;  %v4012_v8 = vcombine.low %v2184_v52, %v2191_v12  ;;  %v2204_v41 = vrot.slane %v2202_v32, 1  ;;  %v4865_v36 = vld [vmem:[%s5846_s3 + $0x38] sm:$0xff]   ;;  %v4867_v7 = vld [vmem:[%s5846_s3 + $0x1c0] sm:$0xff]  }
 0x18d   : > { %2707 = vmatprep.mubr.bf16.mxu0 %v3982_v49  ;;  %4367 = vmatpush3.bf16.msra.mxu0 %v4847_v22  ;;  %v3986_v18 = vcombine.low %v2424_v30, %v2425_v13  ;;  %v2416_v25 = vrot.slane %v2414_v16, 1  ;;  %v2410_v40 = vor.u32 %v2409_v15, %v2405_v21  ;;  %v3916_v53 = vcombine.low %v5667_v54, %v2133_v56  ;;  %v4869_v10 = vld [vmem:[%s5846_s3 + $0x180] sm:$0xff]   ;;  %v5700_v39 = vld [vmem:[#allocation3 + $0x38] sm:$0xf]  ;;  %v2137_v49 = vld [vmem:[#allocation3 + $0x3c] sm:$0x1] }
 0x18e   : > { %4368 = vmatprep.subr.bf16.mxu0 %v4849_v24  ;;  %4567 = vmatpush3.bf16.msra.mxu1 %v4848_v1  ;;  %v2197_v4 = vrot.slane %v2195_v57, 1  ;;  %v2200_v1 = vshrl.u32 %v5651_v29, 16  ;;  %v3915_v2 = vcombine.low %v5678_v3, %v2131_v55  ;;  %v2193_v47 = vshrl.u32 %v5658_v48, 16  ;;  %v5702_v20 = vld [vmem:[#allocation3 + $0x18] sm:$0xf]  ;;  %v4883_v46 = vld [vmem:[%s5846_s3 + $0x210] sm:$0xff]  }
 0x18f   : > { %4568 = vmatprep.subr.bf16.mxu1 %v4852_v11  ;;  %4557 = vmatmul.mubr.bf16.gmra.mrb[12].mxu1 %v3986_v18  ;;  %v2417_v50 = vor.u32 %v2416_v25, %v2412_v23  ;;  %v2216_v22 = vshll.u32 %v3916_v53, 16  ;;  %v2237_v6 = vrot.slane %v5651_v29, 1  ;;  %v2239_v61 = vrot.slane %v3916_v53, 1  ;;  %v4875_v15 = vld [vmem:[%s5846_s3 + $0x1c8] sm:$0xff]   ;;  %v5710_v16 = vld [vmem:[#allocation3 + $0x30] sm:$0xf] }
 0x190   : > { %2708 = vmatmul.mubr.bf16.gmra.mrb[56].mxu0 %v3981_v26  ;;  %4576 = vmatprep.mubr.bf16.mxu1 %v4013_v31  ;;  %v2205_v9 = vor.u32 %v2204_v41, %v2200_v1  ;;  %v2198_v24 = vor.u32 %v2197_v4, %v2193_v47  ;;  %v2209_v5 = vshll.u32 %v3915_v2, 16  ;;  %v4011_v30 = vcombine.low %v5591_v43, %v5596_v58  ;;  %v2135_v37 = vld [vmem:[#allocation3 + $0x34] sm:$0x1]  ;;  %v4877_v43 = vld [vmem:[%s5846_s3 + $0x208] sm:$0xff]   ;;  %v5716_v25 = vld [vmem:[#allocation3 + $0x10] sm:$0xf] }
 0x191   : > { %4369 = vmatpush3.bf16.msra.mxu0 %v4851_v17  ;;  %v3985_v0 = vcombine.low %v2410_v40, %v2417_v50  ;;  %v2236_v13 = vrot.slane %v5658_v48, 1  ;;  %v2238_v17 = vrot.slane %v3915_v2, 1  ;;  %v2218_v18 = vrot.slane %v2216_v22, 1  ;;  %v3089_v26 = vld [vmem:[#allocation3 + $0x14] sm:$0x1]  ;;  %v4876_v31 = vld [vmem:[%s5846_s3 + $0x188] sm:$0xff]  }
 0x192   : > { %4370 = vmatprep.subr.bf16.mxu0 %v4855_v27  ;;  %4569 = vmatpush3.bf16.msra.mxu1 %v4852_v11  ;;  %v3091_v11 = vld [vmem:[#allocation3 + $0x1c] sm:$0x1]  ;;  %v4015_v44 = vcombine.low %v2198_v24, %v2205_v9  ;;  %v3918_v21 = vcombine.low %v5700_v39, %v2137_v49  ;;  %v2214_v58 = vshrl.u32 %v3916_v53, 16  ;;  %v2211_v35 = vrot.slane %v2209_v5, 1  ;;  %v4878_v40 = vld [vmem:[%s5846_s3 + $0x1d0] sm:$0xff]   ;;  %v4884_v56 = vld [vmem:[%s5846_s3 + $0x1d8] sm:$0xff]  }
 0x193   : > { %4570 = vmatprep.subr.bf16.mxu1 %v4859_v34  ;;  %2715 = vmatprep.mubr.bf16.mxu0 %v3985_v0  ;;  %v4016_v23 = vcombine.low %v2236_v13, %v2237_v6  ;;  %v4019_v27 = vcombine.low %v2238_v17, %v2239_v61  ;;  %v3917_v33 = vcombine.low %v5710_v16, %v2135_v37  ;;  %v2207_v50 = vshrl.u32 %v3915_v2, 16  ;;  %v4880_v48 = vld [vmem:[%s5846_s3 + $0x190] sm:$0xff]   ;;  %v4888_v55 = vld [vmem:[%s5846_s3 + $0x218] sm:$0xff]   ;;  %v4889_v41 = vld [vmem:[%s5846_s3 + $0x1e0] sm:$0xff]  }
 0x194   : > { %v2219_v59 = vor.u32 %v2218_v18, %v2214_v58  ;;  %v5729_v29 = vcombine.low %v5716_v25, %v3089_v26  ;;  %v2241_v0 = vrot.slane %v3918_v21, 1  ;;  %v4892_v1 = vld [vmem:[%s5846_s3 + $0x220] sm:$0xff]   ;;  %v5757_v2 = vld [vmem:[#allocation3 + $0x28] sm:$0xf]  ;;  %v4017_v22 = vcombine.low %v5678_v3, %v5667_v54  ;;  %v5768_v6 = vld [vmem:[#allocation3 + $0x20] sm:$0xf] }
 0x195   : > { %4371 = vmatpush3.bf16.msra.mxu0 %v4856_v45  ;;  %v2230_v45 = vshll.u32 %v3918_v21, 16  ;;  %v2223_v12 = vshll.u32 %v3917_v33, 16  ;;  %v2240_v32 = vrot.slane %v3917_v33, 1  ;;  %v2221_v53 = vshrl.u32 %v3917_v33, 16  ;;  %v4891_v47 = vld [vmem:[%s5846_s3 + $0x1a0] sm:$0xff]   ;;  %v4894_v54 = vld [vmem:[%s5846_s3 + $0x1a8] sm:$0xff]  }
 0x196   : > { %4372 = vmatprep.subr.bf16.mxu0 %v4860_v51  ;;  %4571 = vmatpush3.bf16.msra.mxu1 %v4859_v34  ;;  %v5723_v34 = vcombine.low %v5702_v20, %v3091_v11  ;;  %v2212_v51 = vor.u32 %v2211_v35, %v2207_v50  ;;  %v3200_v57 = vrot.slane %v5729_v29, 1  ;;  %v3093_v49 = vld [vmem:[#allocation3 + $0x24] sm:$0x1]  ;;  %v4895_v11 = vld [vmem:[%s5846_s3 + $0x228] sm:$0xff]   ;;  %v3145_v37 = vshrl.u32 %v5729_v29, 16 }
 0x197   : > { %4572 = vmatprep.subr.bf16.mxu1 %v4863_v42  ;;  %v4049_v13 = vcombine.low %v5768_v6, %v3093_v49  ;;  %v4899_v18 = vld [vmem:[%s5846_s3 + $0x230] sm:$0xff]   ;;  %v5799_v35 = vld [vmem:[#allocation3 + $0x30] sm:$0xf]  ;;  %v3097_v33 = vld [vmem:[#allocation3 + $0x34] sm:$0x1] }
 0x198   : > { %2716 = vmatmul.mubr.bf16.gmra.mrb[60].mxu0 %v3984_v62  ;;  %v3201_v52 = vrot.slane %v5723_v34, 1  ;;  %v2232_v62 = vrot.slane %v2230_v45, 1  ;;  %v3154_v4 = vshll.u32 %v5723_v34, 16  ;;  %v4051_v45 = vcombine.low %v5799_v35, %v3097_v33 }
 0x199   : > { %4373 = vmatpush3.bf16.msra.mxu0 %v4862_v60  ;;  %2989 = vmatprep.mubr.bf16.mxu0 %v4012_v8  ;;  %v4018_v60 = vcombine.low %v2212_v51, %v2219_v59  ;;  %v2225_v8 = vrot.slane %v2223_v12, 1  ;;  %v3161_v26 = vshll.u32 %v4049_v13, 16  ;;  %v4902_v59 = vld [vmem:[%s5846_s3 + $0x238] sm:$0xff]  }
 0x19a   : > { %4374 = vmatprep.subr.bf16.mxu0 %v4864_v63  ;;  %4573 = vmatpush3.bf16.msra.mxu1 %v4863_v42  ;;  %v4014_v42 = vcombine.low %v5645_v38, %v5635_v28  ;;  %v4022_v63 = vcombine.low %v2240_v32, %v2241_v0  ;;  %v4105_v28 = vcombine.low %v3200_v57, %v3201_v52  ;;  %v4887_v38 = vld [vmem:[%s5846_s3 + $0x198] sm:$0xff]   ;;  %v3156_v61 = vrot.slane %v3154_v4, 1  ;;  %v3101_v32 = vld [vmem:[#allocation3 + $0x44] sm:$0x1] }
 0x19b   : > { %4574 = vmatprep.subr.bf16.mxu1 %v4866_v14  ;;  %v2226_v9 = vor.u32 %v2225_v8, %v2221_v53  ;;  %v3159_v0 = vshrl.u32 %v4049_v13, 16  ;;  %v3102_v51 = vld [vmem:[#allocation3 + $0x48] sm:$0xf]  ;;  %v3103_v52 = vld [vmem:[#allocation3 + $0x4c] sm:$0x1]  ;;  %v3175_v57 = vshll.u32 %v4051_v45, 16 }
 0x19d   : > { %4375 = vmatpush3.bf16.msra.mxu0 %v4865_v36 }
 0x19e   : > { %4575 = vmatpush3.bf16.msra.mxu1 %v4866_v14  ;;  %4412 = vmatprep.subr.bf16.mxu0 %v4867_v7  ;;  %v2228_v14 = vshrl.u32 %v3918_v21, 16  ;;  %v3095_v7 = vld [vmem:[#allocation3 + $0x2c] sm:$0x1]  ;;  %v5789_v21 = vld [vmem:[#allocation3 + $0x38] sm:$0xf] }
 0x19f   : > { %4584 = vmatprep.subr.bf16.mxu1 %v4872_v19  ;;  %v5771_v5 = vcombine.low %v5757_v2, %v3095_v7 }
 0x1a0   : > { %2990 = vmatmul.mubr.bf16.vlgmr.msra.gmra.mrb[64].mxu0 %v4011_v30  ;;  %v2233_v36 = vor.u32 %v2232_v62, %v2228_v14  ;;  %v3152_v30 = vshrl.u32 %v5723_v34, 16  ;;  %v4103_v62 = vcombine.low %v5716_v25, %v5702_v20 }
 0x1a1   : > { %4413 = vmatpush3.bf16.msra.mxu0 %v4869_v10  ;;  %2997 = vmatprep.mubr.bf16.mxu0 %v4015_v44  ;;  %v4893_v10 = vld [vmem:[%s5846_s3 + $0x1e8] sm:$0xff]   ;;  %v3168_v17 = vshll.u32 %v5771_v5, 16  ;;  %v3203_v12 = vrot.slane %v5771_v5, 1 }
 0x1a2   : > { %4577 = vmatmul.mubr.bf16.vlgmr.msra.gmra.mrb[8].mxu1 %v4016_v23  ;;  %4414 = vmatprep.subr.bf16.mxu0 %v4875_v15  ;;  %v4021_v24 = vcombine.low %v2226_v9, %v2233_v36  ;;  %v4896_v15 = vld [vmem:[%s5846_s3 + $0x1f0] sm:$0xff]   ;;  %v3157_v44 = vor.u32 %v3156_v61, %v3152_v30  ;;  %v3099_v23 = vld [vmem:[#allocation3 + $0x3c] sm:$0x1]  ;;  %v3177_v36 = vrot.slane %v3175_v57, 1  ;;  %v4109_v30 = vcombine.low %v5799_v35, %v5789_v21 }
 0x1a3   : > { %4580 = vmatprep.mubr.bf16.mxu1 %v4019_v27  ;;  %4585 = vmatpush3.bf16.msra.mxu1 %v4872_v19  ;;  %v3147_v19 = vshll.u32 %v5729_v29, 16  ;;  %v4020_v27 = vcombine.low %v5710_v16, %v5700_v39  ;;  %v4052_v50 = vcombine.low %v5789_v21, %v3099_v23  ;;  %v4901_v39 = vld [vmem:[%s5846_s3 + $0x1b8] sm:$0xff]   ;;  %v3163_v16 = vrot.slane %v3161_v26, 1 }
 0x1a4   : > { %4586 = vmatprep.subr.bf16.mxu1 %v4877_v43  ;;  %v3166_v29 = vshrl.u32 %v5771_v5, 16 }
 0x1a5   : > { %4415 = vmatpush3.bf16.msra.mxu0 %v4876_v31  ;;  %v3149_v3 = vrot.slane %v3147_v19, 1  ;;  %v4900_v31 = vld [vmem:[%s5846_s3 + $0x1f8] sm:$0xff]   ;;  %v3180_v4 = vshrl.u32 %v4052_v50, 16 }
 0x1a6   : > { %4416 = vmatprep.subr.bf16.mxu0 %v4878_v40  ;;  %v3170_v40 = vrot.slane %v3168_v17, 1 }
 0x1a7   : > { %4587 = vmatpush3.bf16.msra.mxu1 %v4877_v43  ;;  %v4898_v43 = vld [vmem:[%s5846_s3 + $0x1b0] sm:$0xff]   ;;  %v3150_v58 = vor.u32 %v3149_v3, %v3145_v37 }
 0x1a8   : > { %2998 = vmatmul.mubr.bf16.gmra.mrb[68].mxu0 %v4014_v42  ;;  %4588 = vmatprep.subr.bf16.mxu1 %v4883_v46  ;;  %v3100_v42 = vld [vmem:[#allocation3 + $0x40] sm:$0xf] }
 0x1a9   : > { %4417 = vmatpush3.bf16.msra.mxu0 %v4880_v48  ;;  %3005 = vmatprep.mubr.bf16.mxu0 %v4018_v60  ;;  %v4104_v34 = vcombine.low %v3150_v58, %v3157_v44  ;;  %v3182_v48 = vshll.u32 %v4052_v50, 16  ;;  %v3205_v60 = vrot.slane %v4052_v50, 1  ;;  %v4053_v14 = vcombine.low %v3100_v42, %v3101_v32 }
 0x1aa   : > { %4581 = vmatmul.mubr.bf16.gmra.mrb[12].mxu1 %v4022_v63  ;;  %4418 = vmatprep.subr.bf16.mxu0 %v4884_v56  ;;  %v3164_v56 = vor.u32 %v3163_v16, %v3159_v0  ;;  %v3202_v63 = vrot.slane %v4049_v13, 1 }
 0x1ab   : > { %4589 = vmatpush3.bf16.msra.mxu1 %v4883_v46  ;;  %4600 = vmatprep.mubr.bf16.mxu1 %v4105_v28  ;;  %v3171_v46 = vor.u32 %v3170_v40, %v3166_v29  ;;  %v3184_v8 = vrot.slane %v3182_v48, 1  ;;  %v3206_v20 = vrot.slane %v4053_v14, 1 }
 0x1ac   : > { %4590 = vmatprep.subr.bf16.mxu1 %v4888_v55 }
 0x1ad   : > { %4419 = vmatpush3.bf16.msra.mxu0 %v4887_v38  ;;  %v4107_v28 = vcombine.low %v3164_v56, %v3171_v46  ;;  %v3204_v38 = vrot.slane %v4051_v45, 1  ;;  %v3185_v7 = vor.u32 %v3184_v8, %v3180_v4 }
 0x1ae   : > { %4420 = vmatprep.subr.bf16.mxu0 %v4889_v41  ;;  %v4108_v41 = vcombine.low %v3202_v63, %v3203_v12 }
 0x1af   : > { %4591 = vmatpush3.bf16.msra.mxu1 %v4888_v55  ;;  %v4054_v55 = vcombine.low %v3102_v51, %v3103_v52  ;;  %v4111_v53 = vcombine.low %v3204_v38, %v3205_v60 }
 0x1b0   : > { %3006 = vmatmul.mubr.bf16.gmra.mrb[72].mxu0 %v4017_v22  ;;  %4592 = vmatprep.subr.bf16.mxu1 %v4892_v1  ;;  %v4106_v22 = vcombine.low %v5768_v6, %v5757_v2 }
 0x1b1   : > { %4421 = vmatpush3.bf16.msra.mxu0 %v4891_v47  ;;  %3013 = vmatprep.mubr.bf16.mxu0 %v4021_v24  ;;  %v3189_v47 = vshll.u32 %v4053_v14, 16  ;;  %v3196_v9 = vshll.u32 %v4054_v55, 16  ;;  %v3207_v25 = vrot.slane %v4054_v55, 1  ;;  %v3194_v24 = vshrl.u32 %v4054_v55, 16 }
 0x1b2   : > { %4422 = vmatprep.subr.bf16.mxu0 %v4893_v10 }
 0x1b3   : > { %4593 = vmatpush3.bf16.msra.mxu1 %v4892_v1  ;;  %v3173_v1 = vshrl.u32 %v4051_v45, 16  ;;  %v3191_v49 = vrot.slane %v3189_v47, 1  ;;  %v3198_v61 = vrot.slane %v3196_v9, 1  ;;  %v4114_v5 = vcombine.low %v3206_v20, %v3207_v25 }
 0x1b4   : > { %4594 = vmatprep.subr.bf16.mxu1 %v4895_v11 }
 0x1b5   : > { %4423 = vmatpush3.bf16.msra.mxu0 %v4894_v54  ;;  %v3178_v19 = vor.u32 %v3177_v36, %v3173_v1  ;;  %v3199_v3 = vor.u32 %v3198_v61, %v3194_v24 }
 0x1b6   : > { %4424 = vmatprep.subr.bf16.mxu0 %v4896_v15  ;;  %v4112_v15 = vcombine.low %v3100_v42, %v3102_v51 }
 0x1b7   : > { %4595 = vmatpush3.bf16.msra.mxu1 %v4895_v11  ;;  %v4110_v10 = vcombine.low %v3178_v19, %v3185_v7  ;;  %v3187_v11 = vshrl.u32 %v4053_v14, 16 }
 0x1b8   : > { %3014 = vmatmul.mubr.bf16.gmra.mrb[76].mxu0 %v4020_v27  ;;  %4596 = vmatprep.subr.bf16.mxu1 %v4899_v18 }
 0x1b9   : > { %4425 = vmatpush3.bf16.msra.mxu0 %v4898_v43  ;;  %3473 = vmatprep.mubr.bf16.mxu0 %v4104_v34  ;;  %v3192_v54 = vor.u32 %v3191_v49, %v3187_v11 }
 0x1ba   : > { %4426 = vmatprep.subr.bf16.mxu0 %v4900_v31 }
 0x1bb   : > { %4597 = vmatpush3.bf16.msra.mxu1 %v4899_v18  ;;  %v4113_v13 = vcombine.low %v3192_v54, %v3199_v3 }
 0x1bc   : > { %4598 = vmatprep.subr.bf16.mxu1 %v4902_v59 }
 0x1bd   : > { %4427 = vmatpush3.bf16.msra.mxu0 %v4901_v39 }
 0x1bf   : > { %4599 = vmatpush3.bf16.msra.mxu1 %v4902_v59 }
 0x1c0   : > { %3474 = vmatmul.mubr.bf16.vlgmr.msra.gmra.mrb[80].mxu0 %v4103_v62 }
 0x1c1   : > { %3481 = vmatprep.mubr.bf16.mxu0 %v4107_v28 }
 0x1c2   : > { %4601 = vmatmul.mubr.bf16.vlgmr.msra.gmra.mrb[8].mxu1 %v4108_v41 }
 0x1c3   : > { %4604 = vmatprep.mubr.bf16.mxu1 %v4111_v53 }
 0x1c8   : > { %3482 = vmatmul.mubr.bf16.gmra.mrb[84].mxu0 %v4106_v22 }
 0x1c9   : > { %3489 = vmatprep.mubr.bf16.mxu0 %v4110_v10 }
 0x1ca   : > { %4605 = vmatmul.mubr.bf16.gmra.mrb[12].mxu1 %v4114_v5 }
 0x1d0   : > { %3490 = vmatmul.mubr.bf16.gmra.mrb[88].mxu0 %v4109_v30 }
 0x1d1   : > { %3497 = vmatprep.mubr.bf16.mxu0 %v4113_v13 }
 0x1d8   : > { %3498 = vmatmul.mubr.bf16.gmra.mrb[92].mxu0 %v4112_v15 }
 0x253   : > { %v4324_v2 = vpop.f32.mrb[48].mxu0 }
 0x254   : > { %v4325_v6 = vpop.f32.mrb[49].mxu0 }
 0x255   : > { %v4326_v37 = vadd.f32 %v4325_v6, %v4324_v2  ;;  %v4327_v44 = vpop.f32.mrb[50].mxu0 }
 0x256   : > { %v4328_v17 = vpop.f32.mrb[51].mxu0 }
 0x257   : > { %v4329_v18 = vadd.f32 %v4328_v17, %v4327_v44 }
 0x25b   : > { %v4330_v23 = vpop.f32.mrb[52].mxu0 }
 0x25c   : > { %v4331_v43 = vpop.f32.mrb[53].mxu0 }
 0x25d   : > { %v4332_v58 = vadd.f32 %v4331_v43, %v4330_v23  ;;  %v4333_v26 = vpop.f32.mrb[54].mxu0 }
 0x25e   : > { %v4334_v27 = vpop.f32.mrb[55].mxu0 }
 0x25f   : > { %v4335_v31 = vadd.f32 %v4334_v27, %v4333_v26 }
 0x263   : > { %v4336_v33 = vpop.f32.mrb[56].mxu0 }
 0x264   : > { %v4337_v34 = vpop.f32.mrb[57].mxu0 }
 0x265   : > { %v4338_v21 = vadd.f32 %v4337_v34, %v4336_v33  ;;  %v4339_v35 = vpop.f32.mrb[58].mxu0 }
 0x266   : > { %v4340_v40 = vpop.f32.mrb[59].mxu0 }
 0x267   : > { %v4341_v50 = vadd.f32 %v4340_v40, %v4339_v35 }
 0x26b   : > { %v4342_v59 = vpop.f32.mrb[60].mxu0 }
 0x26c   : > { %v4343_v39 = vpop.f32.mrb[61].mxu0 }
 0x26d   : > { %v4344_v16 = vadd.f32 %v4343_v39, %v4342_v59  ;;  %v4345_v29 = vpop.f32.mrb[62].mxu0 }
 0x26e   : > { %v4346_v45 = vpop.f32.mrb[63].mxu0 }
 0x26f   : > { %v4347_v0 = vadd.f32 %v4346_v45, %v4345_v29 }
 0x273   : > { %v4376_v46 = vpop.f32.mrb[64].mxu0 }
 0x274   : > { %v4377_v48 = vpop.f32.mrb[65].mxu0 }
 0x275   : > { %v4378_v51 = vadd.f32 %v4377_v48, %v4376_v46  ;;  %v4379_v52 = vpop.f32.mrb[66].mxu0 }
 0x276   : > { %v4380_v12 = vpop.f32.mrb[67].mxu0 }
 0x277   : > { %v4635_v42 = vadd.f32 %v4378_v51, %v4326_v37  ;;  %v4381_v32 = vadd.f32 %v4380_v12, %v4379_v52  ;;  %v4139_v37 = vld [vmem:[%s5847_s4] ss:$0 sm:$0xff] }
 0x279   : > { %v4641_v56 = vadd.f32 %v4381_v32, %v4329_v18 }
 0x27b   : > { %v4382_v60 = vpop.f32.mrb[68].mxu0 }
 0x27c   : > { %v4383_v57 = vpop.f32.mrb[69].mxu0 }
 0x27d   : > { %v4384_v62 = vadd.f32 %v4383_v57, %v4382_v60  ;;  %v4385_v63 = vpop.f32.mrb[70].mxu0 }
 0x27e   : > { %v4386_v55 = vpop.f32.mrb[71].mxu0 }
 0x27f   : > { %v4632_v28 = vadd.f32 %v4384_v62, %v4332_v58  ;;  %v4387_v38 = vadd.f32 %v4386_v55, %v4385_v63 }
 0x281   : > { %v4638_v8 = vadd.f32 %v4387_v38, %v4335_v31 }
 0x283   : > { %v4388_v14 = vpop.f32.mrb[72].mxu0 }
 0x284   : > { %v4389_v41 = vpop.f32.mrb[73].mxu0 }
 0x285   : > { %v4390_v53 = vadd.f32 %v4389_v41, %v4388_v14  ;;  %v4391_v36 = vpop.f32.mrb[74].mxu0 }
 0x286   : > { %v4392_v4 = vpop.f32.mrb[75].mxu0 }
 0x287   : > { %v4647_v1 = vadd.f32 %v4390_v53, %v4338_v21  ;;  %v4393_v7 = vadd.f32 %v4392_v4, %v4391_v36 }
 0x289   : > { %v4653_v47 = vadd.f32 %v4393_v7, %v4341_v50 }
 0x28b   : > { %v4394_v9 = vpop.f32.mrb[76].mxu0 }
 0x28c   : > { %v4395_v20 = vpop.f32.mrb[77].mxu0 }
 0x28d   : > { %v4396_v25 = vadd.f32 %v4395_v20, %v4394_v9  ;;  %v4397_v19 = vpop.f32.mrb[78].mxu0 }
 0x28e   : > { %v4398_v22 = vpop.f32.mrb[79].mxu0 }
 0x28f   : > { %v5817_v10 = vadd.f32 %v4396_v25, %v4344_v16  ;;  %v4399_v49 = vadd.f32 %v4398_v22, %v4397_v19 }
 0x291   : > { %v5819_v24 = vadd.f32 %v4399_v49, %v4347_v0 }
 0x293   : > { %v4428_v61 = vpop.f32.mrb[80].mxu0 }
 0x294   : > { %v4429_v5 = vpop.f32.mrb[81].mxu0 }
 0x295   : > { %v4430_v11 = vadd.f32 %v4429_v5, %v4428_v61  ;;  %v4431_v54 = vpop.f32.mrb[82].mxu0  ;;  %v4602_v3 = vpop.f32.mrb[8].mxu1 }
 0x296   : > { %v4432_v30 = vpop.f32.mrb[83].mxu0  ;;  %v3540_v13 = vpop.f32.mrb[9].mxu1 }
 0x297   : > { %v4433_v15 = vadd.f32 %v4432_v30, %v4431_v54  ;;  %v4636_v2 = vadd.f32 %v4635_v42, %v4430_v11  ;;  %v4603_v6 = vpop.f32.mrb[10].mxu1 }
 0x298   : > { %v3543_v44 = vpop.f32.mrb[11].mxu1 }
 0x299   : > { %v4637_v17 = vadd.f32 %v4636_v2, %v3540_v13  ;;  %v4642_v18 = vadd.f32 %v4641_v56, %v4433_v15 }
 0x29b   : > { %v3586_v23 = vadd.f32 %v4637_v17, %v4139_v37  ;;  %v4643_v43 = vadd.f32 %v4642_v18, %v3543_v44  ;;  %v4434_v58 = vpop.f32.mrb[84].mxu0 }
 0x29c   : > { %v4435_v26 = vpop.f32.mrb[85].mxu0 }
 0x29d   : > { %v3594_v27 = vmax.f32 %v3586_v23, 0.0  ;;  %v3587_v31 = vadd.f32 %v4643_v43, %v4139_v37  ;;  %v4436_v33 = vadd.f32 %v4435_v26, %v4434_v58  ;;  %v4437_v34 = vpop.f32.mrb[86].mxu0  ;;  %v4606_v21 = vpop.f32.mrb[12].mxu1 }
 0x29e   : > { %v4438_v35 = vpop.f32.mrb[87].mxu0  ;;  %v3556_v40 = vpop.f32.mrb[13].mxu1 }
 0x29f   : > { %3602 = vst [vmem:[%s5828_s21] sm:$0xff] %v3594_v27  ;;  %v3595_v50 = vmax.f32 %v3587_v31, 0.0  ;;  %v4633_v59 = vadd.f32 %v4632_v28, %v4436_v33  ;;  %v4439_v39 = vadd.f32 %v4438_v35, %v4437_v34  ;;  %v4607_v16 = vpop.f32.mrb[14].mxu1 }
 0x2a0   : > { %v3559_v29 = vpop.f32.mrb[15].mxu1 }
 0x2a1   : > { %3603 = vst [vmem:[%s5828_s21 + $0x8] sm:$0xff] %v3595_v50  ;;  %v4634_v45 = vadd.f32 %v4633_v59, %v4602_v3  ;;  %v4639_v0 = vadd.f32 %v4638_v8, %v4439_v39 }
 0x2a3   : > { %v3588_v46 = vadd.f32 %v4634_v45, %v4139_v37  ;;  %v4640_v48 = vadd.f32 %v4639_v0, %v4603_v6  ;;  %v4440_v51 = vpop.f32.mrb[88].mxu0 }
 0x2a4   : > { %v4441_v52 = vpop.f32.mrb[89].mxu0 }
 0x2a5   : > { %v3596_v12 = vmax.f32 %v3588_v46, 0.0  ;;  %v3589_v42 = vadd.f32 %v4640_v48, %v4139_v37  ;;  %v4442_v32 = vadd.f32 %v4441_v52, %v4440_v51  ;;  %v4443_v56 = vpop.f32.mrb[90].mxu0 }
 0x2a6   : > { %v4444_v60 = vpop.f32.mrb[91].mxu0 }
 0x2a7   : > { %3604 = vst [vmem:[%s5828_s21 + $0x10] sm:$0xff] %v3596_v12  ;;  %v3597_v57 = vmax.f32 %v3589_v42, 0.0  ;;  %v4648_v62 = vadd.f32 %v4647_v1, %v4442_v32  ;;  %v4445_v63 = vadd.f32 %v4444_v60, %v4443_v56 }
 0x2a9   : > { %3605 = vst [vmem:[%s5828_s21 + $0x18] sm:$0xff] %v3597_v57  ;;  %v4649_v55 = vadd.f32 %v4648_v62, %v3556_v40  ;;  %v4654_v28 = vadd.f32 %v4653_v47, %v4445_v63 }
 0x2ab   : > { %v3590_v38 = vadd.f32 %v4649_v55, %v4139_v37  ;;  %v4655_v8 = vadd.f32 %v4654_v28, %v3559_v29  ;;  %v4446_v14 = vpop.f32.mrb[92].mxu0 }
 0x2ac   : > { %v4447_v41 = vpop.f32.mrb[93].mxu0 }
 0x2ad   : > { %v3598_v53 = vmax.f32 %v3590_v38, 0.0  ;;  %v3591_v36 = vadd.f32 %v4655_v8, %v4139_v37  ;;  %v4448_v4 = vadd.f32 %v4447_v41, %v4446_v14  ;;  %v4449_v7 = vpop.f32.mrb[94].mxu0 }
 0x2ae   : > { %v4450_v9 = vpop.f32.mrb[95].mxu0 }
 0x2af   : > { %3606 = vst [vmem:[%s5828_s21 + $0x20] sm:$0xff] %v3598_v53  ;;  %v3599_v20 = vmax.f32 %v3591_v36, 0.0  ;;  %v4645_v1 = vadd.f32 %v5817_v10, %v4448_v4  ;;  %v4451_v25 = vadd.f32 %v4450_v9, %v4449_v7 }
 0x2b1   : > { %3607 = vst [vmem:[%s5828_s21 + $0x28] sm:$0xff] %v3599_v20  ;;  %v4646_v19 = vadd.f32 %v4645_v1, %v4606_v21  ;;  %v4651_v47 = vadd.f32 %v5819_v24, %v4451_v25 }
 0x2b3   : > { %v3592_v22 = vadd.f32 %v4646_v19, %v4139_v37  ;;  %v4652_v49 = vadd.f32 %v4651_v47, %v4607_v16 }
 0x2b5   : > { %v3600_v61 = vmax.f32 %v3592_v22, 0.0  ;;  %v3593_v5 = vadd.f32 %v4652_v49, %v4139_v37 }
 0x2b7   : > { %3608 = vst [vmem:[%s5828_s21 + $0x30] sm:$0xff] %v3600_v61  ;;  %v3601_v11 = vmax.f32 %v3593_v5, 0.0 }
 0x2b9   : > { %3609 = vst [vmem:[%s5828_s21 + $0x38] sm:$0xff] %v3601_v11 }
 0x2ba PF: > { %s15_s18 = sadd.s32 1, %s4919_s18  }
 0x2bb   : > { %p12_p4 = scmp.ge.s32.totalorder %s15_s18, 4  }
 0x2bd   :  { %14 = sbr.rel (!%p12_p4) target bundleno = 1 (0x1), region = 78 }

</bundles_post_ra>
